<compile_context>
chip_gen: v6e
topology: v6e:2x2x1
jax: 0.10.0
libtpu: 0.0.40
codegen_flags: <defaults>
</compile_context>

<pallas_src>
import functools

import jax
import jax.numpy as jnp
import numpy as np
from jax.experimental import pallas as pl
from jax.experimental.pallas import tpu as pltpu

_BN_EPS = 1e-5
_MAX_TP = 512          # pixel-tile cap (lanes); multiple of 128


def _round_up(a, b):
    return (a + b - 1) // b * b


def _pick_pixel_tile(p):
    # >= 2 tiles when possible (v7x megacore balance), capped at _MAX_TP lanes.
    tp = min(_MAX_TP, _round_up(max(p // 2, 1), 128))
    return max(tp, 128)


# ----------------------------- Pallas kernels ------------------------------

def _adder1x1_kernel(x_ref, w_ref, v_ref, o_ref, st_ref):
    """1x1 AdderNet conv + per-tile BN stat partials.

    x_ref : (Cin, TP)    pixels on lanes, channels on sublanes
    w_ref : (Cout, Cin)  weights
    v_ref : (1, TP)      1.0 for real pixels, 0.0 for pixel padding
    o_ref : (Cout, TP)   out[co,p] = -sum_ci |x[ci,p] - w[co,ci]|
    st_ref: (1, Cout, 2) per-tile [sum, sum_sq] over valid pixels
    """
    cin = x_ref.shape[0]
    cout = w_ref.shape[0]
    tp = x_ref.shape[1]
    x = x_ref[...]
    w = w_ref[...]
    acc = jnp.zeros((cout, tp), jnp.float32)
    for ci in range(cin):                      # static unroll, VPU-only work
        acc = acc - jnp.abs(x[ci:ci + 1, :] - w[:, ci:ci + 1])
    o_ref[...] = acc
    av = acc * v_ref[...]                      # mask pixel padding for stats
    s = jnp.sum(av, axis=1, keepdims=True)     # (Cout, 1)
    ss = jnp.sum(av * acc, axis=1, keepdims=True)
    st_ref[...] = jnp.concatenate([s, ss], axis=1).reshape(1, cout, 2)


def _shift_pixels(arr, off):
    """shifted[:, p] = arr[:, (p + off) mod P]   (off is a static Python int)."""
    if off == 0:
        return arr
    return jnp.concatenate([arr[:, off:], arr[:, :off]], axis=1)


def _adder3x3_kernel(y_ref, s1_ref, b1_ref, w_ref, m_ref, v_ref, o_ref, st_ref,
                     *, img_w):
    """Fused bn1-affine+ReLU -> 3x3 AdderNet conv (pad=1, stride=1) + bn2 stat
    partials.  The im2col is built in VMEM via lane shifts + boundary masks.

    y_ref : (Cin, P)          raw conv1 output (resident across the grid)
    s1_ref: (Cin, 1)          bn1 scale
    b1_ref: (Cin, 1)          bn1 bias
    w_ref : (Cout_blk, 9*Cin) weights, k = (kh*3 + kw)*Cin + ci
    m_ref : (9, P)            per-tap spatial-boundary masks
    v_ref : (1, P)            valid-pixel mask (excludes pixel padding)
    o_ref : (Cout_blk, P)
    st_ref: (1, Cout_blk, 2)  [sum, sum_sq] over valid pixels
    """
    cin = y_ref.shape[0]
    pp = y_ref.shape[1]
    cout = o_ref.shape[0]

    # bn1 + ReLU fused in-register (no standalone bn_relu pass / HBM trip).
    y = jnp.maximum(y_ref[...] * s1_ref[...] + b1_ref[...], 0.0)    # (Cin, P)
    wts = w_ref[...]                                                # (Cout, 9*Cin)
    masks = m_ref[...]                                              # (9, P)

    acc = jnp.zeros((cout, pp), jnp.float32)
    t = 0
    for dh in (-1, 0, 1):
        for dw in (-1, 0, 1):
            off = dh * img_w + dw
            # neighbor value; out-of-image neighbors masked to 0 (= zero pad)
            tap = _shift_pixels(y, off) * masks[t:t + 1, :]         # (Cin, P)
            for ci in range(cin):                                   # K-loop, VPU
                k = t * cin + ci
                acc = acc - jnp.abs(tap[ci:ci + 1, :] - wts[:, k:k + 1])
            t += 1
    o_ref[...] = acc

    av = acc * v_ref[...]
    s = jnp.sum(av, axis=1, keepdims=True)
    ss = jnp.sum(av * acc, axis=1, keepdims=True)
    st_ref[...] = jnp.concatenate([s, ss], axis=1).reshape(1, cout, 2)


def _bn_add_relu_kernel(o2_ref, s2_ref, b2_ref, id_ref, o_ref):
    """out = relu( relu(o2 * scale2 + bias2) + identity )."""
    y = jnp.maximum(o2_ref[...] * s2_ref[...] + b2_ref[...], 0.0)
    o_ref[...] = jnp.maximum(y + id_ref[...], 0.0)


# ----------------------------- pallas_call wrappers -------------------------

def _adder1x1(x_cp, w1, valid, tp):
    cin, pp = x_cp.shape
    cout = w1.shape[0]
    ntiles = pp // tp
    return pl.pallas_call(
        _adder1x1_kernel,
        out_shape=(jax.ShapeDtypeStruct((cout, pp), jnp.float32),
                   jax.ShapeDtypeStruct((ntiles, cout, 2), jnp.float32)),
        grid=(ntiles,),
        in_specs=[
            pl.BlockSpec((cin, tp), lambda i: (0, i)),
            pl.BlockSpec((cout, cin), lambda i: (0, 0)),
            pl.BlockSpec((1, tp), lambda i: (0, i)),
        ],
        out_specs=(
            pl.BlockSpec((cout, tp), lambda i: (0, i)),
            pl.BlockSpec((1, cout, 2), lambda i: (i, 0, 0)),
        ),
        compiler_params=pltpu.CompilerParams(
            dimension_semantics=("parallel",)),
    )(x_cp, w1, valid)


def _adder3x3_fused(y_raw, scale1, bias1, w2_flat, masks, valid, img_w):
    cin, pp = y_raw.shape
    cout = w2_flat.shape[0]
    tco = cout            # one output-channel block; full pixel axis per step
    nco = cout // tco
    return pl.pallas_call(
        functools.partial(_adder3x3_kernel, img_w=img_w),
        out_shape=(jax.ShapeDtypeStruct((cout, pp), jnp.float32),
                   jax.ShapeDtypeStruct((nco, tco, 2), jnp.float32)),
        grid=(nco,),
        in_specs=[
            pl.BlockSpec((cin, pp), lambda j: (0, 0)),      # resident activation
            pl.BlockSpec((cin, 1), lambda j: (0, 0)),
            pl.BlockSpec((cin, 1), lambda j: (0, 0)),
            pl.BlockSpec((tco, 9 * cin), lambda j: (j, 0)),
            pl.BlockSpec((9, pp), lambda j: (0, 0)),
            pl.BlockSpec((1, pp), lambda j: (0, 0)),
        ],
        out_specs=(
            pl.BlockSpec((tco, pp), lambda j: (j, 0)),
            pl.BlockSpec((1, tco, 2), lambda j: (j, 0, 0)),
        ),
        compiler_params=pltpu.CompilerParams(
            dimension_semantics=("parallel",),
            vmem_limit_bytes=32 * 1024 * 1024),
    )(y_raw, scale1, bias1, w2_flat, masks, valid)


def _bn_add_relu(out2, scale2, bias2, identity, tp):
    c, pp = out2.shape
    cid = identity.shape[0]
    ntiles = pp // tp
    return pl.pallas_call(
        _bn_add_relu_kernel,
        out_shape=jax.ShapeDtypeStruct((c, pp), jnp.float32),
        grid=(ntiles,),
        in_specs=[
            pl.BlockSpec((c, tp), lambda i: (0, i)),
            pl.BlockSpec((c, 1), lambda i: (0, 0)),
            pl.BlockSpec((c, 1), lambda i: (0, 0)),
            pl.BlockSpec((cid, tp), lambda i: (0, i)),
        ],
        out_specs=pl.BlockSpec((c, tp), lambda i: (0, i)),
        compiler_params=pltpu.CompilerParams(
            dimension_semantics=("parallel",)),
    )(out2, scale2, bias2, identity)


# ----------------------------- plain-JAX glue -------------------------------

def _bn_affine_from_sums(s, ss, count, gamma, beta):
    # BatchNorm2d training-mode forward uses biased batch variance.
    mean = s / count
    var = jnp.maximum(ss / count - mean * mean, 0.0)
    scale = gamma / jnp.sqrt(var + _BN_EPS)
    bias = beta - mean * scale
    return scale[:, None], bias[:, None]          # (C, 1) columns


@functools.partial(jax.jit, static_argnames=("stride",))
def basic_block_forward(x_nchw, params, stride=1):
    assert stride == 1, "BasicBlock with downsample=None requires stride == 1"
    n, cin, h, w = x_nchw.shape
    w1 = params["w1"].reshape(params["w1"].shape[0], -1).astype(jnp.float32)
    planes = w1.shape[0]
    assert planes == cin, "residual add requires inplanes == planes"

    p = n * h * w
    tp = _pick_pixel_tile(p)
    pp = _round_up(p, tp)

    # channels-on-sublanes / pixels-on-lanes slab, zero-padded on pixel axis
    x_cp = jnp.transpose(x_nchw, (1, 0, 2, 3)).reshape(cin, p).astype(jnp.float32)
    x_cp = jnp.pad(x_cp, ((0, 0), (0, pp - p)))

    # Static pixel-coordinate masks (tiny; computed once in XLA).
    pix = jnp.arange(pp, dtype=jnp.int32)
    wi = pix % w
    hi = (pix // w) % h
    valid = (pix < p).astype(jnp.float32)[None, :]                    # (1, Pp)
    tap_masks = []
    for dh in (-1, 0, 1):
        for dw in (-1, 0, 1):
            ok = ((hi + dh >= 0) & (hi + dh < h) &
                  (wi + dw >= 0) & (wi + dw < w))
            tap_masks.append(ok)
    masks = jnp.stack(tap_masks, axis=0).astype(jnp.float32)          # (9, Pp)

    # conv1 (1x1 adder) + bn1 stat partials
    out1, st1 = _adder1x1(x_cp, w1, valid, tp)
    s1, b1 = _bn_affine_from_sums(st1[..., 0].sum(axis=0),
                                  st1[..., 1].sum(axis=0),
                                  p, params["g1"], params["b1"])

    # fused bn1+ReLU -> conv2 (3x3 adder, pad=1) + bn2 stat partials
    w2 = jnp.transpose(params["w2"], (0, 2, 3, 1)).reshape(planes, 9 * planes)
    w2 = w2.astype(jnp.float32)
    out2, st2 = _adder3x3_fused(out1, s1, b1, w2, masks, valid, w)
    st2 = st2.reshape(planes, 2)
    s2, b2 = _bn_affine_from_sums(st2[:, 0], st2[:, 1],
                                  p, params["g2"], params["b2"])

    # fused tail: bn2 affine + ReLU + residual add + ReLU
    out = _bn_add_relu(out2, s2, b2, x_cp, tp)

    out = out[:, :p].reshape(planes, n, h, w)
    return jnp.transpose(out, (1, 0, 2, 3))


# ----------------------------- pure-JAX reference ---------------------------

def _adder_ref(patches, w_flat):
    return -jnp.sum(jnp.abs(patches[:, None, :] - w_flat[None, :, :]), axis=-1)


def _im2col3x3_ref(x_nhwc, stride):
    N, H, W, C = x_nhwc.shape
    Ho = (H + 2 - 3) // stride + 1
    Wo = (W + 2 - 3) // stride + 1
    xp = jnp.pad(x_nhwc, ((0, 0), (1, 1), (1, 1), (0, 0)))
    cols = []
    for kh in range(3):
        for kw in range(3):
            cols.append(xp[:, kh:kh + (Ho - 1) * stride + 1:stride,
                           kw:kw + (Wo - 1) * stride + 1:stride, :])
    pat = jnp.stack(cols, axis=3)                 # (N, Ho, Wo, 9, C)
    pat = jnp.transpose(pat, (0, 1, 2, 4, 3))     # (N, Ho, Wo, C, 9)
    return pat.reshape(N * Ho * Wo, C * 9), (N, Ho, Wo)


def _bn_train_affine_ref(x_flat, gamma, beta, eps=_BN_EPS):
    mean = jnp.mean(x_flat, axis=0)
    var = jnp.var(x_flat, axis=0)
    scale = gamma / jnp.sqrt(var + eps)
    bias = beta - mean * scale
    return scale, bias


def basic_block_ref(x_nchw, params, stride=1):
    N, Cin, H, W = x_nchw.shape
    x_nhwc = jnp.transpose(x_nchw, (0, 2, 3, 1)).astype(jnp.float32)
    x_flat = x_nhwc.reshape(N * H * W, Cin)
    w1 = params["w1"].reshape(params["w1"].shape[0], -1)
    out1 = _adder_ref(x_flat, w1)
    s1, b1 = _bn_train_affine_ref(out1, params["g1"], params["b1"])
    out1 = jnp.maximum(out1 * s1 + b1, 0.0)
    planes = w1.shape[0]
    patches, (_, Ho, Wo) = _im2col3x3_ref(out1.reshape(N, H, W, planes), stride)
    w2 = params["w2"].reshape(params["w2"].shape[0], -1)
    out2 = _adder_ref(patches, w2)
    s2, b2 = _bn_train_affine_ref(out2, params["g2"], params["b2"])
    out = jnp.maximum(jnp.maximum(out2 * s2 + b2, 0.0) + x_flat, 0.0)
    return jnp.transpose(out.reshape(N, Ho, Wo, planes), (0, 3, 1, 2))


# ----------------------------- main -----------------------------------------

if __name__ == "__main__":
    key = jax.random.PRNGKey(0)
    k_x, k_w1, k_w2, k_g1, k_g2 = jax.random.split(key, 5)

    N, C, H, W = 2, 4, 16, 16       # inplanes == planes == 4, stride == 1
    planes = C

    x = jax.random.normal(k_x, (N, C, H, W), dtype=jnp.float32)
    params = {
        "w1": 0.1 * jax.random.normal(k_w1, (planes, C, 1, 1), jnp.float32),
        "g1": 1.0 + 0.1 * jax.random.normal(k_g1, (planes,), jnp.float32),
        "b1": 0.1 * jnp.ones((planes,), jnp.float32),
        "w2": 0.1 * jax.random.normal(k_w2, (planes, planes, 3, 3), jnp.float32),
        "g2": 1.0 + 0.1 * jax.random.normal(k_g2, (planes,), jnp.float32),
        "b2": -0.1 * jnp.ones((planes,), jnp.float32),
    }

    out = jax.block_until_ready(basic_block_forward(x, params, stride=1))
    ref = jax.block_until_ready(basic_block_ref(x, params, stride=1))

    # The kernel path derives BN variance from fused sum / sum-of-squares
    # partials (mathematically identical to jnp.var, differs only at f32
    # rounding), hence 1e-3 tolerance.
    np.testing.assert_allclose(np.asarray(out), np.asarray(ref),
                               rtol=1e-3, atol=1e-3)

    print("KERNEL_OK")
</pallas_src>

<mosaic_0001>
module attributes {stable_mosaic.version = 11 : i64} {
  func.func @_adder3x3_kernel(%arg0: i32, %arg1: memref<4x512xf32, #tpu.memory_space<vmem>>, %arg2: memref<4x1xf32, #tpu.memory_space<vmem>>, %arg3: memref<4x1xf32, #tpu.memory_space<vmem>>, %arg4: memref<4x36xf32, #tpu.memory_space<vmem>>, %arg5: memref<9x512xf32, #tpu.memory_space<vmem>>, %arg6: memref<1x512xf32, #tpu.memory_space<vmem>>, %arg7: memref<4x512xf32, #tpu.memory_space<vmem>>, %arg8: memref<1x4x2xf32, #tpu.memory_space<vmem>>) attributes {dimension_semantics = [#tpu.dimension_semantics<parallel>], iteration_bounds = array<i64: 1>, scalar_prefetch = 0 : i64, scratch_operands = 0 : i64, tpu.core_type = #tpu.core_type<tc>, window_params = [{pipeline_mode = #tpu.pipeline_mode<synchronous>, transform_indices = @transform_0, window_bounds = array<i64: 4, 512>}, {pipeline_mode = #tpu.pipeline_mode<synchronous>, transform_indices = @transform_1, window_bounds = array<i64: 4, 1>}, {pipeline_mode = #tpu.pipeline_mode<synchronous>, transform_indices = @transform_2, window_bounds = array<i64: 4, 1>}, {transform_indices = @transform_3, window_bounds = array<i64: 4, 36>}, {pipeline_mode = #tpu.pipeline_mode<synchronous>, transform_indices = @transform_4, window_bounds = array<i64: 9, 512>}, {pipeline_mode = #tpu.pipeline_mode<synchronous>, transform_indices = @transform_5, window_bounds = array<i64: 1, 512>}, {transform_indices = @transform_6, window_bounds = array<i64: 4, 512>}, {transform_indices = @transform_7, window_bounds = array<i64: 1, 4, 2>}]} {
    %c0 = arith.constant 0 : index
    %c0_0 = arith.constant 0 : index
    %0 = vector.load %arg1[%c0, %c0_0] : memref<4x512xf32, #tpu.memory_space<vmem>>, vector<4x512xf32>
    %c0_1 = arith.constant 0 : index
    %c0_2 = arith.constant 0 : index
    %1 = vector.load %arg2[%c0_1, %c0_2] : memref<4x1xf32, #tpu.memory_space<vmem>>, vector<4x1xf32>
    %2 = vector.broadcast %1 : vector<4x1xf32> to vector<4x512xf32>
    %3 = arith.mulf %0, %2 : vector<4x512xf32>
    %c0_3 = arith.constant 0 : index
    %c0_4 = arith.constant 0 : index
    %4 = vector.load %arg3[%c0_3, %c0_4] : memref<4x1xf32, #tpu.memory_space<vmem>>, vector<4x1xf32>
    %5 = vector.broadcast %4 : vector<4x1xf32> to vector<4x512xf32>
    %6 = arith.addf %3, %5 : vector<4x512xf32>
    %cst = arith.constant 0.000000e+00 : f32
    %7 = vector.broadcast %cst : f32 to vector<4x512xf32>
    %8 = arith.maximumf %6, %7 : vector<4x512xf32>
    %c0_5 = arith.constant 0 : index
    %c0_6 = arith.constant 0 : index
    %9 = vector.load %arg4[%c0_5, %c0_6] : memref<4x36xf32, #tpu.memory_space<vmem>>, vector<4x36xf32>
    %c0_7 = arith.constant 0 : index
    %c0_8 = arith.constant 0 : index
    %10 = vector.load %arg5[%c0_7, %c0_8] : memref<9x512xf32, #tpu.memory_space<vmem>>, vector<9x512xf32>
    %cst_9 = arith.constant 0.000000e+00 : f32
    %11 = vector.broadcast %cst_9 : f32 to vector<4x512xf32>
    %12 = vector.extract_strided_slice %8 {offsets = [0, 495], sizes = [4, 17], strides = [1, 1]} : vector<4x512xf32> to vector<4x17xf32>
    %13 = vector.extract_strided_slice %8 {offsets = [0, 0], sizes = [4, 495], strides = [1, 1]} : vector<4x512xf32> to vector<4x495xf32>
    %14 = tpu.concatenate %12, %13 in 1 : vector<4x17xf32>, vector<4x495xf32> -> vector<4x512xf32>
    %15 = vector.extract_strided_slice %10 {offsets = [0, 0], sizes = [1, 512], strides = [1, 1]} : vector<9x512xf32> to vector<1x512xf32>
    %16 = vector.broadcast %15 : vector<1x512xf32> to vector<4x512xf32>
    %17 = arith.mulf %14, %16 : vector<4x512xf32>
    %18 = vector.extract_strided_slice %17 {offsets = [0, 0], sizes = [1, 512], strides = [1, 1]} : vector<4x512xf32> to vector<1x512xf32>
    %19 = vector.extract_strided_slice %9 {offsets = [0, 0], sizes = [4, 1], strides = [1, 1]} : vector<4x36xf32> to vector<4x1xf32>
    %20 = vector.broadcast %18 : vector<1x512xf32> to vector<4x512xf32>
    %21 = vector.broadcast %19 : vector<4x1xf32> to vector<4x512xf32>
    %22 = arith.subf %20, %21 : vector<4x512xf32>
    %23 = math.absf %22 : vector<4x512xf32>
    %24 = arith.subf %11, %23 : vector<4x512xf32>
    %25 = vector.extract_strided_slice %17 {offsets = [1, 0], sizes = [1, 512], strides = [1, 1]} : vector<4x512xf32> to vector<1x512xf32>
    %26 = vector.extract_strided_slice %9 {offsets = [0, 1], sizes = [4, 1], strides = [1, 1]} : vector<4x36xf32> to vector<4x1xf32>
    %27 = vector.broadcast %25 : vector<1x512xf32> to vector<4x512xf32>
    %28 = vector.broadcast %26 : vector<4x1xf32> to vector<4x512xf32>
    %29 = arith.subf %27, %28 : vector<4x512xf32>
    %30 = math.absf %29 : vector<4x512xf32>
    %31 = arith.subf %24, %30 : vector<4x512xf32>
    %32 = vector.extract_strided_slice %17 {offsets = [2, 0], sizes = [1, 512], strides = [1, 1]} : vector<4x512xf32> to vector<1x512xf32>
    %33 = vector.extract_strided_slice %9 {offsets = [0, 2], sizes = [4, 1], strides = [1, 1]} : vector<4x36xf32> to vector<4x1xf32>
    %34 = vector.broadcast %32 : vector<1x512xf32> to vector<4x512xf32>
    %35 = vector.broadcast %33 : vector<4x1xf32> to vector<4x512xf32>
    %36 = arith.subf %34, %35 : vector<4x512xf32>
    %37 = math.absf %36 : vector<4x512xf32>
    %38 = arith.subf %31, %37 : vector<4x512xf32>
    %39 = vector.extract_strided_slice %17 {offsets = [3, 0], sizes = [1, 512], strides = [1, 1]} : vector<4x512xf32> to vector<1x512xf32>
    %40 = vector.extract_strided_slice %9 {offsets = [0, 3], sizes = [4, 1], strides = [1, 1]} : vector<4x36xf32> to vector<4x1xf32>
    %41 = vector.broadcast %39 : vector<1x512xf32> to vector<4x512xf32>
    %42 = vector.broadcast %40 : vector<4x1xf32> to vector<4x512xf32>
    %43 = arith.subf %41, %42 : vector<4x512xf32>
    %44 = math.absf %43 : vector<4x512xf32>
    %45 = arith.subf %38, %44 : vector<4x512xf32>
    %46 = vector.extract_strided_slice %8 {offsets = [0, 496], sizes = [4, 16], strides = [1, 1]} : vector<4x512xf32> to vector<4x16xf32>
    %47 = vector.extract_strided_slice %8 {offsets = [0, 0], sizes = [4, 496], strides = [1, 1]} : vector<4x512xf32> to vector<4x496xf32>
    %48 = tpu.concatenate %46, %47 in 1 : vector<4x16xf32>, vector<4x496xf32> -> vector<4x512xf32>
    %49 = vector.extract_strided_slice %10 {offsets = [1, 0], sizes = [1, 512], strides = [1, 1]} : vector<9x512xf32> to vector<1x512xf32>
    %50 = vector.broadcast %49 : vector<1x512xf32> to vector<4x512xf32>
    %51 = arith.mulf %48, %50 : vector<4x512xf32>
    %52 = vector.extract_strided_slice %51 {offsets = [0, 0], sizes = [1, 512], strides = [1, 1]} : vector<4x512xf32> to vector<1x512xf32>
    %53 = vector.extract_strided_slice %9 {offsets = [0, 4], sizes = [4, 1], strides = [1, 1]} : vector<4x36xf32> to vector<4x1xf32>
    %54 = vector.broadcast %52 : vector<1x512xf32> to vector<4x512xf32>
    %55 = vector.broadcast %53 : vector<4x1xf32> to vector<4x512xf32>
    %56 = arith.subf %54, %55 : vector<4x512xf32>
    %57 = math.absf %56 : vector<4x512xf32>
    %58 = arith.subf %45, %57 : vector<4x512xf32>
    %59 = vector.extract_strided_slice %51 {offsets = [1, 0], sizes = [1, 512], strides = [1, 1]} : vector<4x512xf32> to vector<1x512xf32>
    %60 = vector.extract_strided_slice %9 {offsets = [0, 5], sizes = [4, 1], strides = [1, 1]} : vector<4x36xf32> to vector<4x1xf32>
    %61 = vector.broadcast %59 : vector<1x512xf32> to vector<4x512xf32>
    %62 = vector.broadcast %60 : vector<4x1xf32> to vector<4x512xf32>
    %63 = arith.subf %61, %62 : vector<4x512xf32>
    %64 = math.absf %63 : vector<4x512xf32>
    %65 = arith.subf %58, %64 : vector<4x512xf32>
    %66 = vector.extract_strided_slice %51 {offsets = [2, 0], sizes = [1, 512], strides = [1, 1]} : vector<4x512xf32> to vector<1x512xf32>
    %67 = vector.extract_strided_slice %9 {offsets = [0, 6], sizes = [4, 1], strides = [1, 1]} : vector<4x36xf32> to vector<4x1xf32>
    %68 = vector.broadcast %66 : vector<1x512xf32> to vector<4x512xf32>
    %69 = vector.broadcast %67 : vector<4x1xf32> to vector<4x512xf32>
    %70 = arith.subf %68, %69 : vector<4x512xf32>
    %71 = math.absf %70 : vector<4x512xf32>
    %72 = arith.subf %65, %71 : vector<4x512xf32>
    %73 = vector.extract_strided_slice %51 {offsets = [3, 0], sizes = [1, 512], strides = [1, 1]} : vector<4x512xf32> to vector<1x512xf32>
    %74 = vector.extract_strided_slice %9 {offsets = [0, 7], sizes = [4, 1], strides = [1, 1]} : vector<4x36xf32> to vector<4x1xf32>
    %75 = vector.broadcast %73 : vector<1x512xf32> to vector<4x512xf32>
    %76 = vector.broadcast %74 : vector<4x1xf32> to vector<4x512xf32>
    %77 = arith.subf %75, %76 : vector<4x512xf32>
    %78 = math.absf %77 : vector<4x512xf32>
    %79 = arith.subf %72, %78 : vector<4x512xf32>
    %80 = vector.extract_strided_slice %8 {offsets = [0, 497], sizes = [4, 15], strides = [1, 1]} : vector<4x512xf32> to vector<4x15xf32>
    %81 = vector.extract_strided_slice %8 {offsets = [0, 0], sizes = [4, 497], strides = [1, 1]} : vector<4x512xf32> to vector<4x497xf32>
    %82 = tpu.concatenate %80, %81 in 1 : vector<4x15xf32>, vector<4x497xf32> -> vector<4x512xf32>
    %83 = vector.extract_strided_slice %10 {offsets = [2, 0], sizes = [1, 512], strides = [1, 1]} : vector<9x512xf32> to vector<1x512xf32>
    %84 = vector.broadcast %83 : vector<1x512xf32> to vector<4x512xf32>
    %85 = arith.mulf %82, %84 : vector<4x512xf32>
    %86 = vector.extract_strided_slice %85 {offsets = [0, 0], sizes = [1, 512], strides = [1, 1]} : vector<4x512xf32> to vector<1x512xf32>
    %87 = vector.extract_strided_slice %9 {offsets = [0, 8], sizes = [4, 1], strides = [1, 1]} : vector<4x36xf32> to vector<4x1xf32>
    %88 = vector.broadcast %86 : vector<1x512xf32> to vector<4x512xf32>
    %89 = vector.broadcast %87 : vector<4x1xf32> to vector<4x512xf32>
    %90 = arith.subf %88, %89 : vector<4x512xf32>
    %91 = math.absf %90 : vector<4x512xf32>
    %92 = arith.subf %79, %91 : vector<4x512xf32>
    %93 = vector.extract_strided_slice %85 {offsets = [1, 0], sizes = [1, 512], strides = [1, 1]} : vector<4x512xf32> to vector<1x512xf32>
    %94 = vector.extract_strided_slice %9 {offsets = [0, 9], sizes = [4, 1], strides = [1, 1]} : vector<4x36xf32> to vector<4x1xf32>
    %95 = vector.broadcast %93 : vector<1x512xf32> to vector<4x512xf32>
    %96 = vector.broadcast %94 : vector<4x1xf32> to vector<4x512xf32>
    %97 = arith.subf %95, %96 : vector<4x512xf32>
    %98 = math.absf %97 : vector<4x512xf32>
    %99 = arith.subf %92, %98 : vector<4x512xf32>
    %100 = vector.extract_strided_slice %85 {offsets = [2, 0], sizes = [1, 512], strides = [1, 1]} : vector<4x512xf32> to vector<1x512xf32>
    %101 = vector.extract_strided_slice %9 {offsets = [0, 10], sizes = [4, 1], strides = [1, 1]} : vector<4x36xf32> to vector<4x1xf32>
    %102 = vector.broadcast %100 : vector<1x512xf32> to vector<4x512xf32>
    %103 = vector.broadcast %101 : vector<4x1xf32> to vector<4x512xf32>
    %104 = arith.subf %102, %103 : vector<4x512xf32>
    %105 = math.absf %104 : vector<4x512xf32>
    %106 = arith.subf %99, %105 : vector<4x512xf32>
    %107 = vector.extract_strided_slice %85 {offsets = [3, 0], sizes = [1, 512], strides = [1, 1]} : vector<4x512xf32> to vector<1x512xf32>
    %108 = vector.extract_strided_slice %9 {offsets = [0, 11], sizes = [4, 1], strides = [1, 1]} : vector<4x36xf32> to vector<4x1xf32>
    %109 = vector.broadcast %107 : vector<1x512xf32> to vector<4x512xf32>
    %110 = vector.broadcast %108 : vector<4x1xf32> to vector<4x512xf32>
    %111 = arith.subf %109, %110 : vector<4x512xf32>
    %112 = math.absf %111 : vector<4x512xf32>
    %113 = arith.subf %106, %112 : vector<4x512xf32>
    %114 = vector.extract_strided_slice %8 {offsets = [0, 511], sizes = [4, 1], strides = [1, 1]} : vector<4x512xf32> to vector<4x1xf32>
    %115 = vector.extract_strided_slice %8 {offsets = [0, 0], sizes = [4, 511], strides = [1, 1]} : vector<4x512xf32> to vector<4x511xf32>
    %116 = tpu.concatenate %114, %115 in 1 : vector<4x1xf32>, vector<4x511xf32> -> vector<4x512xf32>
    %117 = vector.extract_strided_slice %10 {offsets = [3, 0], sizes = [1, 512], strides = [1, 1]} : vector<9x512xf32> to vector<1x512xf32>
    %118 = vector.broadcast %117 : vector<1x512xf32> to vector<4x512xf32>
    %119 = arith.mulf %116, %118 : vector<4x512xf32>
    %120 = vector.extract_strided_slice %119 {offsets = [0, 0], sizes = [1, 512], strides = [1, 1]} : vector<4x512xf32> to vector<1x512xf32>
    %121 = vector.extract_strided_slice %9 {offsets = [0, 12], sizes = [4, 1], strides = [1, 1]} : vector<4x36xf32> to vector<4x1xf32>
    %122 = vector.broadcast %120 : vector<1x512xf32> to vector<4x512xf32>
    %123 = vector.broadcast %121 : vector<4x1xf32> to vector<4x512xf32>
    %124 = arith.subf %122, %123 : vector<4x512xf32>
    %125 = math.absf %124 : vector<4x512xf32>
    %126 = arith.subf %113, %125 : vector<4x512xf32>
    %127 = vector.extract_strided_slice %119 {offsets = [1, 0], sizes = [1, 512], strides = [1, 1]} : vector<4x512xf32> to vector<1x512xf32>
    %128 = vector.extract_strided_slice %9 {offsets = [0, 13], sizes = [4, 1], strides = [1, 1]} : vector<4x36xf32> to vector<4x1xf32>
    %129 = vector.broadcast %127 : vector<1x512xf32> to vector<4x512xf32>
    %130 = vector.broadcast %128 : vector<4x1xf32> to vector<4x512xf32>
    %131 = arith.subf %129, %130 : vector<4x512xf32>
    %132 = math.absf %131 : vector<4x512xf32>
    %133 = arith.subf %126, %132 : vector<4x512xf32>
    %134 = vector.extract_strided_slice %119 {offsets = [2, 0], sizes = [1, 512], strides = [1, 1]} : vector<4x512xf32> to vector<1x512xf32>
    %135 = vector.extract_strided_slice %9 {offsets = [0, 14], sizes = [4, 1], strides = [1, 1]} : vector<4x36xf32> to vector<4x1xf32>
    %136 = vector.broadcast %134 : vector<1x512xf32> to vector<4x512xf32>
    %137 = vector.broadcast %135 : vector<4x1xf32> to vector<4x512xf32>
    %138 = arith.subf %136, %137 : vector<4x512xf32>
    %139 = math.absf %138 : vector<4x512xf32>
    %140 = arith.subf %133, %139 : vector<4x512xf32>
    %141 = vector.extract_strided_slice %119 {offsets = [3, 0], sizes = [1, 512], strides = [1, 1]} : vector<4x512xf32> to vector<1x512xf32>
    %142 = vector.extract_strided_slice %9 {offsets = [0, 15], sizes = [4, 1], strides = [1, 1]} : vector<4x36xf32> to vector<4x1xf32>
    %143 = vector.broadcast %141 : vector<1x512xf32> to vector<4x512xf32>
    %144 = vector.broadcast %142 : vector<4x1xf32> to vector<4x512xf32>
    %145 = arith.subf %143, %144 : vector<4x512xf32>
    %146 = math.absf %145 : vector<4x512xf32>
    %147 = arith.subf %140, %146 : vector<4x512xf32>
    %148 = vector.extract_strided_slice %10 {offsets = [4, 0], sizes = [1, 512], strides = [1, 1]} : vector<9x512xf32> to vector<1x512xf32>
    %149 = vector.broadcast %148 : vector<1x512xf32> to vector<4x512xf32>
    %150 = arith.mulf %8, %149 : vector<4x512xf32>
    %151 = vector.extract_strided_slice %150 {offsets = [0, 0], sizes = [1, 512], strides = [1, 1]} : vector<4x512xf32> to vector<1x512xf32>
    %152 = vector.extract_strided_slice %9 {offsets = [0, 16], sizes = [4, 1], strides = [1, 1]} : vector<4x36xf32> to vector<4x1xf32>
    %153 = vector.broadcast %151 : vector<1x512xf32> to vector<4x512xf32>
    %154 = vector.broadcast %152 : vector<4x1xf32> to vector<4x512xf32>
    %155 = arith.subf %153, %154 : vector<4x512xf32>
    %156 = math.absf %155 : vector<4x512xf32>
    %157 = arith.subf %147, %156 : vector<4x512xf32>
    %158 = vector.extract_strided_slice %150 {offsets = [1, 0], sizes = [1, 512], strides = [1, 1]} : vector<4x512xf32> to vector<1x512xf32>
    %159 = vector.extract_strided_slice %9 {offsets = [0, 17], sizes = [4, 1], strides = [1, 1]} : vector<4x36xf32> to vector<4x1xf32>
    %160 = vector.broadcast %158 : vector<1x512xf32> to vector<4x512xf32>
    %161 = vector.broadcast %159 : vector<4x1xf32> to vector<4x512xf32>
    %162 = arith.subf %160, %161 : vector<4x512xf32>
    %163 = math.absf %162 : vector<4x512xf32>
    %164 = arith.subf %157, %163 : vector<4x512xf32>
    %165 = vector.extract_strided_slice %150 {offsets = [2, 0], sizes = [1, 512], strides = [1, 1]} : vector<4x512xf32> to vector<1x512xf32>
    %166 = vector.extract_strided_slice %9 {offsets = [0, 18], sizes = [4, 1], strides = [1, 1]} : vector<4x36xf32> to vector<4x1xf32>
    %167 = vector.broadcast %165 : vector<1x512xf32> to vector<4x512xf32>
    %168 = vector.broadcast %166 : vector<4x1xf32> to vector<4x512xf32>
    %169 = arith.subf %167, %168 : vector<4x512xf32>
    %170 = math.absf %169 : vector<4x512xf32>
    %171 = arith.subf %164, %170 : vector<4x512xf32>
    %172 = vector.extract_strided_slice %150 {offsets = [3, 0], sizes = [1, 512], strides = [1, 1]} : vector<4x512xf32> to vector<1x512xf32>
    %173 = vector.extract_strided_slice %9 {offsets = [0, 19], sizes = [4, 1], strides = [1, 1]} : vector<4x36xf32> to vector<4x1xf32>
    %174 = vector.broadcast %172 : vector<1x512xf32> to vector<4x512xf32>
    %175 = vector.broadcast %173 : vector<4x1xf32> to vector<4x512xf32>
    %176 = arith.subf %174, %175 : vector<4x512xf32>
    %177 = math.absf %176 : vector<4x512xf32>
    %178 = arith.subf %171, %177 : vector<4x512xf32>
    %179 = vector.extract_strided_slice %8 {offsets = [0, 1], sizes = [4, 511], strides = [1, 1]} : vector<4x512xf32> to vector<4x511xf32>
    %180 = vector.extract_strided_slice %8 {offsets = [0, 0], sizes = [4, 1], strides = [1, 1]} : vector<4x512xf32> to vector<4x1xf32>
    %181 = tpu.concatenate %179, %180 in 1 : vector<4x511xf32>, vector<4x1xf32> -> vector<4x512xf32>
    %182 = vector.extract_strided_slice %10 {offsets = [5, 0], sizes = [1, 512], strides = [1, 1]} : vector<9x512xf32> to vector<1x512xf32>
    %183 = vector.broadcast %182 : vector<1x512xf32> to vector<4x512xf32>
    %184 = arith.mulf %181, %183 : vector<4x512xf32>
    %185 = vector.extract_strided_slice %184 {offsets = [0, 0], sizes = [1, 512], strides = [1, 1]} : vector<4x512xf32> to vector<1x512xf32>
    %186 = vector.extract_strided_slice %9 {offsets = [0, 20], sizes = [4, 1], strides = [1, 1]} : vector<4x36xf32> to vector<4x1xf32>
    %187 = vector.broadcast %185 : vector<1x512xf32> to vector<4x512xf32>
    %188 = vector.broadcast %186 : vector<4x1xf32> to vector<4x512xf32>
    %189 = arith.subf %187, %188 : vector<4x512xf32>
    %190 = math.absf %189 : vector<4x512xf32>
    %191 = arith.subf %178, %190 : vector<4x512xf32>
    %192 = vector.extract_strided_slice %184 {offsets = [1, 0], sizes = [1, 512], strides = [1, 1]} : vector<4x512xf32> to vector<1x512xf32>
    %193 = vector.extract_strided_slice %9 {offsets = [0, 21], sizes = [4, 1], strides = [1, 1]} : vector<4x36xf32> to vector<4x1xf32>
    %194 = vector.broadcast %192 : vector<1x512xf32> to vector<4x512xf32>
    %195 = vector.broadcast %193 : vector<4x1xf32> to vector<4x512xf32>
    %196 = arith.subf %194, %195 : vector<4x512xf32>
    %197 = math.absf %196 : vector<4x512xf32>
    %198 = arith.subf %191, %197 : vector<4x512xf32>
    %199 = vector.extract_strided_slice %184 {offsets = [2, 0], sizes = [1, 512], strides = [1, 1]} : vector<4x512xf32> to vector<1x512xf32>
    %200 = vector.extract_strided_slice %9 {offsets = [0, 22], sizes = [4, 1], strides = [1, 1]} : vector<4x36xf32> to vector<4x1xf32>
    %201 = vector.broadcast %199 : vector<1x512xf32> to vector<4x512xf32>
    %202 = vector.broadcast %200 : vector<4x1xf32> to vector<4x512xf32>
    %203 = arith.subf %201, %202 : vector<4x512xf32>
    %204 = math.absf %203 : vector<4x512xf32>
    %205 = arith.subf %198, %204 : vector<4x512xf32>
    %206 = vector.extract_strided_slice %184 {offsets = [3, 0], sizes = [1, 512], strides = [1, 1]} : vector<4x512xf32> to vector<1x512xf32>
    %207 = vector.extract_strided_slice %9 {offsets = [0, 23], sizes = [4, 1], strides = [1, 1]} : vector<4x36xf32> to vector<4x1xf32>
    %208 = vector.broadcast %206 : vector<1x512xf32> to vector<4x512xf32>
    %209 = vector.broadcast %207 : vector<4x1xf32> to vector<4x512xf32>
    %210 = arith.subf %208, %209 : vector<4x512xf32>
    %211 = math.absf %210 : vector<4x512xf32>
    %212 = arith.subf %205, %211 : vector<4x512xf32>
    %213 = vector.extract_strided_slice %8 {offsets = [0, 15], sizes = [4, 497], strides = [1, 1]} : vector<4x512xf32> to vector<4x497xf32>
    %214 = vector.extract_strided_slice %8 {offsets = [0, 0], sizes = [4, 15], strides = [1, 1]} : vector<4x512xf32> to vector<4x15xf32>
    %215 = tpu.concatenate %213, %214 in 1 : vector<4x497xf32>, vector<4x15xf32> -> vector<4x512xf32>
    %216 = vector.extract_strided_slice %10 {offsets = [6, 0], sizes = [1, 512], strides = [1, 1]} : vector<9x512xf32> to vector<1x512xf32>
    %217 = vector.broadcast %216 : vector<1x512xf32> to vector<4x512xf32>
    %218 = arith.mulf %215, %217 : vector<4x512xf32>
    %219 = vector.extract_strided_slice %218 {offsets = [0, 0], sizes = [1, 512], strides = [1, 1]} : vector<4x512xf32> to vector<1x512xf32>
    %220 = vector.extract_strided_slice %9 {offsets = [0, 24], sizes = [4, 1], strides = [1, 1]} : vector<4x36xf32> to vector<4x1xf32>
    %221 = vector.broadcast %219 : vector<1x512xf32> to vector<4x512xf32>
    %222 = vector.broadcast %220 : vector<4x1xf32> to vector<4x512xf32>
    %223 = arith.subf %221, %222 : vector<4x512xf32>
    %224 = math.absf %223 : vector<4x512xf32>
    %225 = arith.subf %212, %224 : vector<4x512xf32>
    %226 = vector.extract_strided_slice %218 {offsets = [1, 0], sizes = [1, 512], strides = [1, 1]} : vector<4x512xf32> to vector<1x512xf32>
    %227 = vector.extract_strided_slice %9 {offsets = [0, 25], sizes = [4, 1], strides = [1, 1]} : vector<4x36xf32> to vector<4x1xf32>
    %228 = vector.broadcast %226 : vector<1x512xf32> to vector<4x512xf32>
    %229 = vector.broadcast %227 : vector<4x1xf32> to vector<4x512xf32>
    %230 = arith.subf %228, %229 : vector<4x512xf32>
    %231 = math.absf %230 : vector<4x512xf32>
    %232 = arith.subf %225, %231 : vector<4x512xf32>
    %233 = vector.extract_strided_slice %218 {offsets = [2, 0], sizes = [1, 512], strides = [1, 1]} : vector<4x512xf32> to vector<1x512xf32>
    %234 = vector.extract_strided_slice %9 {offsets = [0, 26], sizes = [4, 1], strides = [1, 1]} : vector<4x36xf32> to vector<4x1xf32>
    %235 = vector.broadcast %233 : vector<1x512xf32> to vector<4x512xf32>
    %236 = vector.broadcast %234 : vector<4x1xf32> to vector<4x512xf32>
    %237 = arith.subf %235, %236 : vector<4x512xf32>
    %238 = math.absf %237 : vector<4x512xf32>
    %239 = arith.subf %232, %238 : vector<4x512xf32>
    %240 = vector.extract_strided_slice %218 {offsets = [3, 0], sizes = [1, 512], strides = [1, 1]} : vector<4x512xf32> to vector<1x512xf32>
    %241 = vector.extract_strided_slice %9 {offsets = [0, 27], sizes = [4, 1], strides = [1, 1]} : vector<4x36xf32> to vector<4x1xf32>
    %242 = vector.broadcast %240 : vector<1x512xf32> to vector<4x512xf32>
    %243 = vector.broadcast %241 : vector<4x1xf32> to vector<4x512xf32>
    %244 = arith.subf %242, %243 : vector<4x512xf32>
    %245 = math.absf %244 : vector<4x512xf32>
    %246 = arith.subf %239, %245 : vector<4x512xf32>
    %247 = vector.extract_strided_slice %8 {offsets = [0, 16], sizes = [4, 496], strides = [1, 1]} : vector<4x512xf32> to vector<4x496xf32>
    %248 = vector.extract_strided_slice %8 {offsets = [0, 0], sizes = [4, 16], strides = [1, 1]} : vector<4x512xf32> to vector<4x16xf32>
    %249 = tpu.concatenate %247, %248 in 1 : vector<4x496xf32>, vector<4x16xf32> -> vector<4x512xf32>
    %250 = vector.extract_strided_slice %10 {offsets = [7, 0], sizes = [1, 512], strides = [1, 1]} : vector<9x512xf32> to vector<1x512xf32>
    %251 = vector.broadcast %250 : vector<1x512xf32> to vector<4x512xf32>
    %252 = arith.mulf %249, %251 : vector<4x512xf32>
    %253 = vector.extract_strided_slice %252 {offsets = [0, 0], sizes = [1, 512], strides = [1, 1]} : vector<4x512xf32> to vector<1x512xf32>
    %254 = vector.extract_strided_slice %9 {offsets = [0, 28], sizes = [4, 1], strides = [1, 1]} : vector<4x36xf32> to vector<4x1xf32>
    %255 = vector.broadcast %253 : vector<1x512xf32> to vector<4x512xf32>
    %256 = vector.broadcast %254 : vector<4x1xf32> to vector<4x512xf32>
    %257 = arith.subf %255, %256 : vector<4x512xf32>
    %258 = math.absf %257 : vector<4x512xf32>
    %259 = arith.subf %246, %258 : vector<4x512xf32>
    %260 = vector.extract_strided_slice %252 {offsets = [1, 0], sizes = [1, 512], strides = [1, 1]} : vector<4x512xf32> to vector<1x512xf32>
    %261 = vector.extract_strided_slice %9 {offsets = [0, 29], sizes = [4, 1], strides = [1, 1]} : vector<4x36xf32> to vector<4x1xf32>
    %262 = vector.broadcast %260 : vector<1x512xf32> to vector<4x512xf32>
    %263 = vector.broadcast %261 : vector<4x1xf32> to vector<4x512xf32>
    %264 = arith.subf %262, %263 : vector<4x512xf32>
    %265 = math.absf %264 : vector<4x512xf32>
    %266 = arith.subf %259, %265 : vector<4x512xf32>
    %267 = vector.extract_strided_slice %252 {offsets = [2, 0], sizes = [1, 512], strides = [1, 1]} : vector<4x512xf32> to vector<1x512xf32>
    %268 = vector.extract_strided_slice %9 {offsets = [0, 30], sizes = [4, 1], strides = [1, 1]} : vector<4x36xf32> to vector<4x1xf32>
    %269 = vector.broadcast %267 : vector<1x512xf32> to vector<4x512xf32>
    %270 = vector.broadcast %268 : vector<4x1xf32> to vector<4x512xf32>
    %271 = arith.subf %269, %270 : vector<4x512xf32>
    %272 = math.absf %271 : vector<4x512xf32>
    %273 = arith.subf %266, %272 : vector<4x512xf32>
    %274 = vector.extract_strided_slice %252 {offsets = [3, 0], sizes = [1, 512], strides = [1, 1]} : vector<4x512xf32> to vector<1x512xf32>
    %275 = vector.extract_strided_slice %9 {offsets = [0, 31], sizes = [4, 1], strides = [1, 1]} : vector<4x36xf32> to vector<4x1xf32>
    %276 = vector.broadcast %274 : vector<1x512xf32> to vector<4x512xf32>
    %277 = vector.broadcast %275 : vector<4x1xf32> to vector<4x512xf32>
    %278 = arith.subf %276, %277 : vector<4x512xf32>
    %279 = math.absf %278 : vector<4x512xf32>
    %280 = arith.subf %273, %279 : vector<4x512xf32>
    %281 = vector.extract_strided_slice %8 {offsets = [0, 17], sizes = [4, 495], strides = [1, 1]} : vector<4x512xf32> to vector<4x495xf32>
    %282 = vector.extract_strided_slice %8 {offsets = [0, 0], sizes = [4, 17], strides = [1, 1]} : vector<4x512xf32> to vector<4x17xf32>
    %283 = tpu.concatenate %281, %282 in 1 : vector<4x495xf32>, vector<4x17xf32> -> vector<4x512xf32>
    %284 = vector.extract_strided_slice %10 {offsets = [8, 0], sizes = [1, 512], strides = [1, 1]} : vector<9x512xf32> to vector<1x512xf32>
    %285 = vector.broadcast %284 : vector<1x512xf32> to vector<4x512xf32>
    %286 = arith.mulf %283, %285 : vector<4x512xf32>
    %287 = vector.extract_strided_slice %286 {offsets = [0, 0], sizes = [1, 512], strides = [1, 1]} : vector<4x512xf32> to vector<1x512xf32>
    %288 = vector.extract_strided_slice %9 {offsets = [0, 32], sizes = [4, 1], strides = [1, 1]} : vector<4x36xf32> to vector<4x1xf32>
    %289 = vector.broadcast %287 : vector<1x512xf32> to vector<4x512xf32>
    %290 = vector.broadcast %288 : vector<4x1xf32> to vector<4x512xf32>
    %291 = arith.subf %289, %290 : vector<4x512xf32>
    %292 = math.absf %291 : vector<4x512xf32>
    %293 = arith.subf %280, %292 : vector<4x512xf32>
    %294 = vector.extract_strided_slice %286 {offsets = [1, 0], sizes = [1, 512], strides = [1, 1]} : vector<4x512xf32> to vector<1x512xf32>
    %295 = vector.extract_strided_slice %9 {offsets = [0, 33], sizes = [4, 1], strides = [1, 1]} : vector<4x36xf32> to vector<4x1xf32>
    %296 = vector.broadcast %294 : vector<1x512xf32> to vector<4x512xf32>
    %297 = vector.broadcast %295 : vector<4x1xf32> to vector<4x512xf32>
    %298 = arith.subf %296, %297 : vector<4x512xf32>
    %299 = math.absf %298 : vector<4x512xf32>
    %300 = arith.subf %293, %299 : vector<4x512xf32>
    %301 = vector.extract_strided_slice %286 {offsets = [2, 0], sizes = [1, 512], strides = [1, 1]} : vector<4x512xf32> to vector<1x512xf32>
    %302 = vector.extract_strided_slice %9 {offsets = [0, 34], sizes = [4, 1], strides = [1, 1]} : vector<4x36xf32> to vector<4x1xf32>
    %303 = vector.broadcast %301 : vector<1x512xf32> to vector<4x512xf32>
    %304 = vector.broadcast %302 : vector<4x1xf32> to vector<4x512xf32>
    %305 = arith.subf %303, %304 : vector<4x512xf32>
    %306 = math.absf %305 : vector<4x512xf32>
    %307 = arith.subf %300, %306 : vector<4x512xf32>
    %308 = vector.extract_strided_slice %286 {offsets = [3, 0], sizes = [1, 512], strides = [1, 1]} : vector<4x512xf32> to vector<1x512xf32>
    %309 = vector.extract_strided_slice %9 {offsets = [0, 35], sizes = [4, 1], strides = [1, 1]} : vector<4x36xf32> to vector<4x1xf32>
    %310 = vector.broadcast %308 : vector<1x512xf32> to vector<4x512xf32>
    %311 = vector.broadcast %309 : vector<4x1xf32> to vector<4x512xf32>
    %312 = arith.subf %310, %311 : vector<4x512xf32>
    %313 = math.absf %312 : vector<4x512xf32>
    %314 = arith.subf %307, %313 : vector<4x512xf32>
    %c0_10 = arith.constant 0 : index
    %c0_11 = arith.constant 0 : index
    %315 = vector.load %arg7[%c0_10, %c0_11] : memref<4x512xf32, #tpu.memory_space<vmem>>, vector<4x512xf32>
    tpu.vector_store %arg7[%c0_10, %c0_11], %314 {strides = array<i32>} : memref<4x512xf32, #tpu.memory_space<vmem>>, vector<4x512xf32>,
    %c0_12 = arith.constant 0 : index
    %c0_13 = arith.constant 0 : index
    %316 = vector.load %arg6[%c0_12, %c0_13] : memref<1x512xf32, #tpu.memory_space<vmem>>, vector<1x512xf32>
    %317 = vector.broadcast %316 : vector<1x512xf32> to vector<4x512xf32>
    %318 = arith.mulf %314, %317 : vector<4x512xf32>
    %cst_14 = arith.constant dense<0.000000e+00> : vector<4xf32>
    %319 = vector.multi_reduction <add>, %318, %cst_14 [1] : vector<4x512xf32> to vector<4xf32>
    %320 = vector.shape_cast %319 : vector<4xf32> to vector<4x1xf32>
    %321 = arith.mulf %318, %314 : vector<4x512xf32>
    %cst_15 = arith.constant dense<0.000000e+00> : vector<4xf32>
    %322 = vector.multi_reduction <add>, %321, %cst_15 [1] : vector<4x512xf32> to vector<4xf32>
    %323 = vector.shape_cast %322 : vector<4xf32> to vector<4x1xf32>
    %324 = tpu.concatenate %320, %323 in 1 : vector<4x1xf32>, vector<4x1xf32> -> vector<4x2xf32>
    %325 = vector.shape_cast %324 : vector<4x2xf32> to vector<1x4x2xf32>
    %c0_16 = arith.constant 0 : index
    %c0_17 = arith.constant 0 : index
    %c0_18 = arith.constant 0 : index
    %326 = vector.load %arg8[%c0_16, %c0_17, %c0_18] : memref<1x4x2xf32, #tpu.memory_space<vmem>>, vector<1x4x2xf32>
    tpu.vector_store %arg8[%c0_16, %c0_17, %c0_18], %325 {strides = array<i32>} : memref<1x4x2xf32, #tpu.memory_space<vmem>>, vector<1x4x2xf32>,
    return
  }
  func.func @transform_0(%arg0: i32) -> (i32, i32) {
    %c0_i32 = arith.constant 0 : i32
    %c0_i32_0 = arith.constant 0 : i32
    %c0_i32_1 = arith.constant 0 : i32
    return %c0_i32, %c0_i32_0 : i32, i32
  }
  func.func @transform_1(%arg0: i32) -> (i32, i32) {
    %c0_i32 = arith.constant 0 : i32
    %c0_i32_0 = arith.constant 0 : i32
    %c0_i32_1 = arith.constant 0 : i32
    return %c0_i32, %c0_i32_0 : i32, i32
  }
  func.func @transform_2(%arg0: i32) -> (i32, i32) {
    %c0_i32 = arith.constant 0 : i32
    %c0_i32_0 = arith.constant 0 : i32
    %c0_i32_1 = arith.constant 0 : i32
    return %c0_i32, %c0_i32_0 : i32, i32
  }
  func.func @transform_3(%arg0: i32) -> (i32, i32) {
    %c0_i32 = arith.constant 0 : i32
    %c0_i32_0 = arith.constant 0 : i32
    return %arg0, %c0_i32 : i32, i32
  }
  func.func @transform_4(%arg0: i32) -> (i32, i32) {
    %c0_i32 = arith.constant 0 : i32
    %c0_i32_0 = arith.constant 0 : i32
    %c0_i32_1 = arith.constant 0 : i32
    return %c0_i32, %c0_i32_0 : i32, i32
  }
  func.func @transform_5(%arg0: i32) -> (i32, i32) {
    %c0_i32 = arith.constant 0 : i32
    %c0_i32_0 = arith.constant 0 : i32
    %c0_i32_1 = arith.constant 0 : i32
    return %c0_i32, %c0_i32_0 : i32, i32
  }
  func.func @transform_6(%arg0: i32) -> (i32, i32) {
    %c0_i32 = arith.constant 0 : i32
    %c0_i32_0 = arith.constant 0 : i32
    return %arg0, %c0_i32 : i32, i32
  }
  func.func @transform_7(%arg0: i32) -> (i32, i32, i32) {
    %c0_i32 = arith.constant 0 : i32
    %c0_i32_0 = arith.constant 0 : i32
    %c0_i32_1 = arith.constant 0 : i32
    return %arg0, %c0_i32, %c0_i32_0 : i32, i32, i32
  }
}

module attributes {stable_mosaic.version = 11 : i64} {
  func.func @_adder1x1_kernel(%arg0: i32, %arg1: memref<4x256xf32, #tpu.memory_space<vmem>>, %arg2: memref<4x4xf32, #tpu.memory_space<vmem>>, %arg3: memref<1x256xf32, #tpu.memory_space<vmem>>, %arg4: memref<4x256xf32, #tpu.memory_space<vmem>>, %arg5: memref<1x4x2xf32, #tpu.memory_space<vmem>>) attributes {dimension_semantics = [#tpu.dimension_semantics<parallel>], iteration_bounds = array<i64: 2>, scalar_prefetch = 0 : i64, scratch_operands = 0 : i64, tpu.core_type = #tpu.core_type<tc>, window_params = [{transform_indices = @transform_0, window_bounds = array<i64: 4, 256>}, {pipeline_mode = #tpu.pipeline_mode<synchronous>, transform_indices = @transform_1, window_bounds = array<i64: 4, 4>}, {transform_indices = @transform_2, window_bounds = array<i64: 1, 256>}, {transform_indices = @transform_3, window_bounds = array<i64: 4, 256>}, {transform_indices = @transform_4, window_bounds = array<i64: 1, 4, 2>}]} {
    %c0 = arith.constant 0 : index
    %c0_0 = arith.constant 0 : index
    %0 = vector.load %arg1[%c0, %c0_0] : memref<4x256xf32, #tpu.memory_space<vmem>>, vector<4x256xf32>
    %c0_1 = arith.constant 0 : index
    %c0_2 = arith.constant 0 : index
    %1 = vector.load %arg2[%c0_1, %c0_2] : memref<4x4xf32, #tpu.memory_space<vmem>>, vector<4x4xf32>
    %cst = arith.constant 0.000000e+00 : f32
    %2 = vector.broadcast %cst : f32 to vector<4x256xf32>
    %3 = vector.extract_strided_slice %0 {offsets = [0, 0], sizes = [1, 256], strides = [1, 1]} : vector<4x256xf32> to vector<1x256xf32>
    %4 = vector.extract_strided_slice %1 {offsets = [0, 0], sizes = [4, 1], strides = [1, 1]} : vector<4x4xf32> to vector<4x1xf32>
    %5 = vector.broadcast %3 : vector<1x256xf32> to vector<4x256xf32>
    %6 = vector.broadcast %4 : vector<4x1xf32> to vector<4x256xf32>
    %7 = arith.subf %5, %6 : vector<4x256xf32>
    %8 = math.absf %7 : vector<4x256xf32>
    %9 = arith.subf %2, %8 : vector<4x256xf32>
    %10 = vector.extract_strided_slice %0 {offsets = [1, 0], sizes = [1, 256], strides = [1, 1]} : vector<4x256xf32> to vector<1x256xf32>
    %11 = vector.extract_strided_slice %1 {offsets = [0, 1], sizes = [4, 1], strides = [1, 1]} : vector<4x4xf32> to vector<4x1xf32>
    %12 = vector.broadcast %10 : vector<1x256xf32> to vector<4x256xf32>
    %13 = vector.broadcast %11 : vector<4x1xf32> to vector<4x256xf32>
    %14 = arith.subf %12, %13 : vector<4x256xf32>
    %15 = math.absf %14 : vector<4x256xf32>
    %16 = arith.subf %9, %15 : vector<4x256xf32>
    %17 = vector.extract_strided_slice %0 {offsets = [2, 0], sizes = [1, 256], strides = [1, 1]} : vector<4x256xf32> to vector<1x256xf32>
    %18 = vector.extract_strided_slice %1 {offsets = [0, 2], sizes = [4, 1], strides = [1, 1]} : vector<4x4xf32> to vector<4x1xf32>
    %19 = vector.broadcast %17 : vector<1x256xf32> to vector<4x256xf32>
    %20 = vector.broadcast %18 : vector<4x1xf32> to vector<4x256xf32>
    %21 = arith.subf %19, %20 : vector<4x256xf32>
    %22 = math.absf %21 : vector<4x256xf32>
    %23 = arith.subf %16, %22 : vector<4x256xf32>
    %24 = vector.extract_strided_slice %0 {offsets = [3, 0], sizes = [1, 256], strides = [1, 1]} : vector<4x256xf32> to vector<1x256xf32>
    %25 = vector.extract_strided_slice %1 {offsets = [0, 3], sizes = [4, 1], strides = [1, 1]} : vector<4x4xf32> to vector<4x1xf32>
    %26 = vector.broadcast %24 : vector<1x256xf32> to vector<4x256xf32>
    %27 = vector.broadcast %25 : vector<4x1xf32> to vector<4x256xf32>
    %28 = arith.subf %26, %27 : vector<4x256xf32>
    %29 = math.absf %28 : vector<4x256xf32>
    %30 = arith.subf %23, %29 : vector<4x256xf32>
    %c0_3 = arith.constant 0 : index
    %c0_4 = arith.constant 0 : index
    %31 = vector.load %arg4[%c0_3, %c0_4] : memref<4x256xf32, #tpu.memory_space<vmem>>, vector<4x256xf32>
    tpu.vector_store %arg4[%c0_3, %c0_4], %30 {strides = array<i32>} : memref<4x256xf32, #tpu.memory_space<vmem>>, vector<4x256xf32>,
    %c0_5 = arith.constant 0 : index
    %c0_6 = arith.constant 0 : index
    %32 = vector.load %arg3[%c0_5, %c0_6] : memref<1x256xf32, #tpu.memory_space<vmem>>, vector<1x256xf32>
    %33 = vector.broadcast %32 : vector<1x256xf32> to vector<4x256xf32>
    %34 = arith.mulf %30, %33 : vector<4x256xf32>
    %cst_7 = arith.constant dense<0.000000e+00> : vector<4xf32>
    %35 = vector.multi_reduction <add>, %34, %cst_7 [1] : vector<4x256xf32> to vector<4xf32>
    %36 = vector.shape_cast %35 : vector<4xf32> to vector<4x1xf32>
    %37 = arith.mulf %34, %30 : vector<4x256xf32>
    %cst_8 = arith.constant dense<0.000000e+00> : vector<4xf32>
    %38 = vector.multi_reduction <add>, %37, %cst_8 [1] : vector<4x256xf32> to vector<4xf32>
    %39 = vector.shape_cast %38 : vector<4xf32> to vector<4x1xf32>
    %40 = tpu.concatenate %36, %39 in 1 : vector<4x1xf32>, vector<4x1xf32> -> vector<4x2xf32>
    %41 = vector.shape_cast %40 : vector<4x2xf32> to vector<1x4x2xf32>
    %c0_9 = arith.constant 0 : index
    %c0_10 = arith.constant 0 : index
    %c0_11 = arith.constant 0 : index
    %42 = vector.load %arg5[%c0_9, %c0_10, %c0_11] : memref<1x4x2xf32, #tpu.memory_space<vmem>>, vector<1x4x2xf32>
    tpu.vector_store %arg5[%c0_9, %c0_10, %c0_11], %41 {strides = array<i32>} : memref<1x4x2xf32, #tpu.memory_space<vmem>>, vector<1x4x2xf32>,
    return
  }
  func.func @transform_0(%arg0: i32) -> (i32, i32) {
    %c0_i32 = arith.constant 0 : i32
    %c0_i32_0 = arith.constant 0 : i32
    return %c0_i32, %arg0 : i32, i32
  }
  func.func @transform_1(%arg0: i32) -> (i32, i32) {
    %c0_i32 = arith.constant 0 : i32
    %c0_i32_0 = arith.constant 0 : i32
    %c0_i32_1 = arith.constant 0 : i32
    return %c0_i32, %c0_i32_0 : i32, i32
  }
  func.func @transform_2(%arg0: i32) -> (i32, i32) {
    %c0_i32 = arith.constant 0 : i32
    %c0_i32_0 = arith.constant 0 : i32
    return %c0_i32, %arg0 : i32, i32
  }
  func.func @transform_3(%arg0: i32) -> (i32, i32) {
    %c0_i32 = arith.constant 0 : i32
    %c0_i32_0 = arith.constant 0 : i32
    return %c0_i32, %arg0 : i32, i32
  }
  func.func @transform_4(%arg0: i32) -> (i32, i32, i32) {
    %c0_i32 = arith.constant 0 : i32
    %c0_i32_0 = arith.constant 0 : i32
    %c0_i32_1 = arith.constant 0 : i32
    return %arg0, %c0_i32, %c0_i32_0 : i32, i32, i32
  }
}

module attributes {stable_mosaic.version = 11 : i64} {
  func.func @_bn_add_relu_kernel(%arg0: i32, %arg1: memref<4x256xf32, #tpu.memory_space<vmem>>, %arg2: memref<4x1xf32, #tpu.memory_space<vmem>>, %arg3: memref<4x1xf32, #tpu.memory_space<vmem>>, %arg4: memref<4x256xf32, #tpu.memory_space<vmem>>, %arg5: memref<4x256xf32, #tpu.memory_space<vmem>>) attributes {dimension_semantics = [#tpu.dimension_semantics<parallel>], iteration_bounds = array<i64: 2>, scalar_prefetch = 0 : i64, scratch_operands = 0 : i64, tpu.core_type = #tpu.core_type<tc>, window_params = [{transform_indices = @transform_0, window_bounds = array<i64: 4, 256>}, {pipeline_mode = #tpu.pipeline_mode<synchronous>, transform_indices = @transform_1, window_bounds = array<i64: 4, 1>}, {pipeline_mode = #tpu.pipeline_mode<synchronous>, transform_indices = @transform_2, window_bounds = array<i64: 4, 1>}, {transform_indices = @transform_3, window_bounds = array<i64: 4, 256>}, {transform_indices = @transform_4, window_bounds = array<i64: 4, 256>}]} {
    %c0 = arith.constant 0 : index
    %c0_0 = arith.constant 0 : index
    %0 = vector.load %arg1[%c0, %c0_0] : memref<4x256xf32, #tpu.memory_space<vmem>>, vector<4x256xf32>
    %c0_1 = arith.constant 0 : index
    %c0_2 = arith.constant 0 : index
    %1 = vector.load %arg2[%c0_1, %c0_2] : memref<4x1xf32, #tpu.memory_space<vmem>>, vector<4x1xf32>
    %2 = vector.broadcast %1 : vector<4x1xf32> to vector<4x256xf32>
    %3 = arith.mulf %0, %2 : vector<4x256xf32>
    %c0_3 = arith.constant 0 : index
    %c0_4 = arith.constant 0 : index
    %4 = vector.load %arg3[%c0_3, %c0_4] : memref<4x1xf32, #tpu.memory_space<vmem>>, vector<4x1xf32>
    %5 = vector.broadcast %4 : vector<4x1xf32> to vector<4x256xf32>
    %6 = arith.addf %3, %5 : vector<4x256xf32>
    %cst = arith.constant 0.000000e+00 : f32
    %7 = vector.broadcast %cst : f32 to vector<4x256xf32>
    %8 = arith.maximumf %6, %7 : vector<4x256xf32>
    %c0_5 = arith.constant 0 : index
    %c0_6 = arith.constant 0 : index
    %9 = vector.load %arg4[%c0_5, %c0_6] : memref<4x256xf32, #tpu.memory_space<vmem>>, vector<4x256xf32>
    %10 = arith.addf %8, %9 : vector<4x256xf32>
    %cst_7 = arith.constant 0.000000e+00 : f32
    %11 = vector.broadcast %cst_7 : f32 to vector<4x256xf32>
    %12 = arith.maximumf %10, %11 : vector<4x256xf32>
    %c0_8 = arith.constant 0 : index
    %c0_9 = arith.constant 0 : index
    %13 = vector.load %arg5[%c0_8, %c0_9] : memref<4x256xf32, #tpu.memory_space<vmem>>, vector<4x256xf32>
    tpu.vector_store %arg5[%c0_8, %c0_9], %12 {strides = array<i32>} : memref<4x256xf32, #tpu.memory_space<vmem>>, vector<4x256xf32>,
    return
  }
  func.func @transform_0(%arg0: i32) -> (i32, i32) {
    %c0_i32 = arith.constant 0 : i32
    %c0_i32_0 = arith.constant 0 : i32
    return %c0_i32, %arg0 : i32, i32
  }
  func.func @transform_1(%arg0: i32) -> (i32, i32) {
    %c0_i32 = arith.constant 0 : i32
    %c0_i32_0 = arith.constant 0 : i32
    %c0_i32_1 = arith.constant 0 : i32
    return %c0_i32, %c0_i32_0 : i32, i32
  }
  func.func @transform_2(%arg0: i32) -> (i32, i32) {
    %c0_i32 = arith.constant 0 : i32
    %c0_i32_0 = arith.constant 0 : i32
    %c0_i32_1 = arith.constant 0 : i32
    return %c0_i32, %c0_i32_0 : i32, i32
  }
  func.func @transform_3(%arg0: i32) -> (i32, i32) {
    %c0_i32 = arith.constant 0 : i32
    %c0_i32_0 = arith.constant 0 : i32
    return %c0_i32, %arg0 : i32, i32
  }
  func.func @transform_4(%arg0: i32) -> (i32, i32) {
    %c0_i32 = arith.constant 0 : i32
    %c0_i32_0 = arith.constant 0 : i32
    return %c0_i32, %arg0 : i32, i32
  }
}

</mosaic_0001>

<bundles_post_ra>
// kernel: basic_block_forward.3
= control target key start
LH: loop header
LB: loop body
LE: loop exit
PB: predicated region body
PF: predicated region fallthrough
CT: control target
= control target key end

     0   :  { %s546_s15 = smov 0   ;;  %s585_s0 = inlined_call_operand.vmem [shape: f32[4,512], index: 0, kind: input, shape index: {}]   ;;  %s586_s1 = inlined_call_operand.vmem [shape: f32[4,4], index: 1, kind: input, shape index: {}]   ;;  %s587_s2 = inlined_call_operand.vmem [shape: f32[1,512], index: 2, kind: input, shape index: {}]   ;;  %s588_s3 = inlined_call_operand.vmem [shape: f32[4,512], index: 3, kind: output, shape index: {0}]   ;;  %s589_s4 = inlined_call_operand.vmem [shape: f32[2,4,2], index: 4, kind: output, shape index: {1}]  }
   0x1 LB: > { %s552_s16 = sadd.s32 4294967295, %s515_s15   ;;  %p483_p0 = scmp.ge.s32.totalorder %s515_s15, 1  ;;  %s515_s15 = sphi %s546_s15, %s15_s15  }
   0x2   : > { %p176_p1 = scmp.lt.s32.totalorder %s515_s15, 3 }
   0x4   : > { %p177_p2 = pnand %p483_p0, %p176_p1 }
   0x5   : > { %s484_s19 = sshll.u32 (!%p177_p2), %s552_s16, 1  ;;  %p227_p4 = scmp.lt.s32.totalorder (!%p177_p2), %s552_s16, 1 }
   0x6   : > { %180 = sbr.rel (%p177_p2) target bundleno = 299 (0x12b), region = 32  ;;  %p211_p3 = scmp.lt.s32.totalorder (!%p177_p2), %s484_s19, 3 }
   0xb   : > { %v232_v0 = vld [vmem:[%s586_s1] sm:$0xf]  ;;  %v517_v1 = vmov 0   ;;  %v518_v2 = vmov 2   ;;  %v519_v3 = vmov 1   ;;  %v520_v4 = vmov 3  }
   0xc   : > { %504 = vset.pattern.permute.xlu0 %v517_v1  ;;  %506 = vset.pattern.permute.xlu1 %v518_v2  ;;  %s591_s19 = smov (!%p211_p3, %s484_s19), 3  ;;  %v234_v5 = vlaneseq  ;;  %vm366_vm0 = vcmask 1043456   ;;  %s593_s16 = smov (!%p227_p4, %s552_s16), 1  ;;  %vm379_vm1 = vcmask 7168   ;;  %vm381_vm2 = vcmask 11264  }
   0xd   : > { %254 = vperm.xlu0 %504, %v232_v0   ;;  %310 = vperm.xlu1 %506, %v232_v0   ;;  %s485_s20 = sshll.u32 %s591_s19, 2  ;;  %s219_s26 = scalar_lea.vmem %s587_s2, %s591_s19 }
   0xe   : > { %v235_v6 = vshrl.u32 %v234_v5, 7  ;;  %s214_s23 = scalar_lea.vmem %s585_s0, %s485_s20  ;;  %v352_v52 = vld [vmem:[%s219_s26] sm:$0x3]  ;;  %s225_s29 = scalar_lea.vmem %s588_s3, %s485_s20 }
   0xf   : > { %v231_v9 = vld [vmem:[%s214_s23] sm:$0xff]  ;;  %s489_s30 = sshll.u32 %s593_s16, 2 }
  0x10   : > { %v236_v7 = vsub.s32 0, %v235_v6  ;;  %v240_v8 = vsub.s32 4, %v235_v6  ;;  %v293_v12 = vsub.s32 2, %v235_v6  ;;  %v297_v13 = vsub.s32 6, %v235_v6  ;;  %s230_s7 = scalar_lea.vmem %s589_s4, %s489_s30 }
  0x11   : > { %505 = vset.pattern.permute.xlu0 %v519_v3  ;;  %507 = vset.pattern.permute.xlu1 %v520_v4  ;;  %v265_v14 = vsub.s32 1, %v235_v6  ;;  %v269_v15 = vsub.s32 5, %v235_v6  ;;  %v321_v16 = vsub.s32 3, %v235_v6  ;;  %v325_v17 = vsub.s32 7, %v235_v6 }
  0x12   : > { %282 = vperm.xlu0 %505, %v232_v0   ;;  %338 = vperm.xlu1 %507, %v232_v0   ;;  %v237_v10 = vrot.slane %v231_v9, %v236_v7  ;;  %v241_v11 = vrot.slane %v231_v9, %v240_v8  ;;  %v294_v20 = vrot.slane %v231_v9, %v293_v12 }
  0x13   : > { %v298_v21 = vrot.slane %v231_v9, %v297_v13  ;;  %v266_v22 = vrot.slane %v231_v9, %v265_v14  ;;  %v270_v23 = vrot.slane %v231_v9, %v269_v15  ;;  %v322_v24 = vrot.slane %v231_v9, %v321_v16 }
  0x14   : > { %v247_v18 = vrot.slane %v237_v10, %v236_v7  ;;  %v251_v19 = vrot.slane %v241_v11, %v236_v7  ;;  %v326_v25 = vrot.slane %v231_v9, %v325_v17  ;;  %v304_v30 = vrot.slane %v294_v20, %v293_v12 }
  0x15   : > { %v308_v31 = vrot.slane %v298_v21, %v293_v12  ;;  %v276_v32 = vrot.slane %v266_v22, %v265_v14  ;;  %v280_v33 = vrot.slane %v270_v23, %v265_v14  ;;  %v332_v34 = vrot.slane %v322_v24, %v321_v16 }
  0x16   : > { %508 = vset.pattern.permute.xlu0 %v520_v4  ;;  %v336_v35 = vrot.slane %v326_v25, %v321_v16  ;;  %v357_v59 = vrot.slane %v352_v52, %v236_v7  ;;  %v361_v60 = vrot.slane %v352_v52, %v265_v14 }
  0x88   : > { %v255_v26 = vpop.permute.xlu0 %254  ;;  %v311_v27 = vpop.permute.xlu1 %310 }
  0x89   : > { %v257_v28 = vsub.f32 %v247_v18, %v255_v26  ;;  %v258_v29 = vsub.f32 %v251_v19, %v255_v26  ;;  %v313_v38 = vsub.f32 %v304_v30, %v311_v27  ;;  %v314_v39 = vsub.f32 %v308_v31, %v311_v27 }
  0x8b   : > { %v259_v36 = vand.u32 2147483647, %v257_v28  ;;  %v260_v37 = vand.u32 2147483647, %v258_v29  ;;  %v315_v50 = vand.u32 2147483647, %v313_v38 }
  0x8c   : > { %v316_v51 = vand.u32 2147483647, %v314_v39 }
  0x8d   : > { %v283_v40 = vpop.permute.xlu0 %282  ;;  %v339_v41 = vpop.permute.xlu1 %338  ;;  %v261_v46 = vsub.f32 0.0, %v259_v36  ;;  %v262_v47 = vsub.f32 0.0, %v260_v37 }
  0x8e   : > { %v285_v42 = vsub.f32 %v276_v32, %v283_v40  ;;  %v286_v43 = vsub.f32 %v280_v33, %v283_v40  ;;  %v341_v44 = vsub.f32 %v332_v34, %v339_v41  ;;  %v342_v45 = vsub.f32 %v336_v35, %v339_v41 }
  0x90   : > { %v287_v48 = vand.u32 2147483647, %v285_v42  ;;  %v288_v49 = vand.u32 2147483647, %v286_v43  ;;  %v343_v55 = vand.u32 2147483647, %v341_v44 }
  0x91   : > { %v344_v56 = vand.u32 2147483647, %v342_v45 }
  0x92   : > { %v289_v53 = vsub.f32 %v261_v46, %v287_v48  ;;  %v290_v54 = vsub.f32 %v262_v47, %v288_v49 }
  0x94   : > { %v317_v57 = vsub.f32 %v289_v53, %v315_v50  ;;  %v318_v58 = vsub.f32 %v290_v54, %v316_v51 }
  0x96   : > { %v345_v61 = vsub.f32 %v317_v57, %v343_v55  ;;  %v346_v62 = vsub.f32 %v318_v58, %v344_v56 }
  0x98   : > { %v349_v63 = vcombine.low %v345_v61, %v346_v62  ;;  %v364_v0 = vmul.f32 %v357_v59, %v345_v61  ;;  %v365_v1 = vmul.f32 %v361_v60, %v346_v62 }
  0x9a   : > { %351 = vst [vmem:[%s225_s29] sm:$0xff] %v349_v63  ;;  %v367_v2 = vsel %vm366_vm0, %v364_v0, 0.0  ;;  %v368_v3 = vsel %vm366_vm0, %v365_v1, 0.0  ;;  %v372_v4 = vmul.f32 %v364_v0, %v345_v61  ;;  %v373_v5 = vmul.f32 %v365_v1, %v346_v62 }
  0x9b   : > { %v369_v6 = vadd.f32 %v368_v3, %v367_v2 }
  0x9c   : > { %v374_v7 = vsel %vm366_vm0, %v372_v4, 0.0  ;;  %v375_v8 = vsel %vm366_vm0, %v373_v5, 0.0 }
  0x9d   : > { %370 = vadd.xlane.f32.xlu1 %v369_v6  ;;  %v376_v9 = vadd.f32 %v375_v8, %v374_v7 }
  0x9f   : > { %377 = vadd.xlane.f32.xlu0 %v376_v9 }
 0x126   : > { %v371_v10 = vpop.xlane.xlu1 %370 }
 0x128   : > { %v378_v11 = vpop.xlane.xlu0 %377 }
 0x129   : > { %v380_v12 = vsel %vm379_vm1, %v371_v10, %v378_v11 }
 0x12a   : > { %382 = vst.msk [vmem:[%s230_s7] sm:$0xf] %vm381_vm2, %v380_v12 }
 0x12b PF: > { %s15_s15 = sadd.s32 1, %s515_s15  }
 0x12c   : > { %p12_p5 = scmp.ge.s32.totalorder %s15_s15, 4  }
 0x12e   :  { %14 = sbr.rel (!%p12_p5) target bundleno = 1 (0x1), region = 77 }

// kernel: basic_block_forward.5
= control target key start
LH: loop header
LB: loop body
LE: loop exit
PB: predicated region body
PF: predicated region fallthrough
CT: control target
= control target key end

     0   :  { %s384_s15 = smov 0   ;;  %s410_s0 = inlined_call_operand.vmem [shape: f32[4,512], index: 0, kind: input, shape index: {}]   ;;  %s411_s1 = inlined_call_operand.vmem [shape: f32[4,1], index: 1, kind: input, shape index: {}]   ;;  %s412_s2 = inlined_call_operand.vmem [shape: f32[4,1], index: 2, kind: input, shape index: {}]   ;;  %s413_s3 = inlined_call_operand.vmem [shape: f32[4,512], index: 3, kind: input, shape index: {}]   ;;  %s414_s4 = inlined_call_operand.vmem [shape: f32[4,512], index: 4, kind: output, shape index: {}]  }
   0x1 LB: > { %s325_s16 = sadd.s32 4294967295, %s355_s15   ;;  %p329_p0 = scmp.ge.s32.totalorder %s355_s15, 1  ;;  %s355_s15 = sphi %s384_s15, %s14_s15  }
   0x2   : > { %p174_p1 = scmp.lt.s32.totalorder %s355_s15, 3 }
   0x4   : > { %p175_p2 = pnand %p329_p0, %p174_p1 }
   0x5   : > { %s330_s21 = sshll.u32 (!%p175_p2), %s325_s16, 1 }
   0x6   : > { %178 = sbr.rel (%p175_p2) target bundleno = 152 (0x98), region = 36  ;;  %p206_p3 = scmp.lt.s32.totalorder (!%p175_p2), %s330_s21, 3 }
   0xb   : > { %v224_v0 = vld [vmem:[%s411_s1] sm:$0xf]  ;;  %v357_v1 = vmov 0   ;;  %v358_v3 = vmov 839922192   ;;  %v232_v5 = vlaneseq  ;;  %s416_s21 = smov (!%p206_p3, %s330_s21), 3 }
   0xc   : > { %348 = vset.pattern.permute.xlu0 %v357_v1  ;;  %v238_v2 = vld [vmem:[%s412_s2] sm:$0xf]  ;;  %v230_v4 = vunpack.c.l.s4 %v358_v3  ;;  %s331_s22 = sshll.u32 %s416_s21, 2 }
   0xd   : > { %227 = vperm.xlu0 %348, %v224_v0   ;;  %v233_v7 = vshrl.u32 %v232_v5, 7  ;;  %s209_s25 = scalar_lea.vmem %s410_s0, %s331_s22  ;;  %s215_s28 = scalar_lea.vmem %s413_s3, %s331_s22 }
   0xe   : > { %v231_v6 = vunpack.c.0.s8 %v230_v4  ;;  %v223_v11 = vld [vmem:[%s209_s25] sm:$0xff]  ;;  %s221_s5 = scalar_lea.vmem %s414_s4, %s331_s22 }
   0xf   : > { %v253_v16 = vld [vmem:[%s215_s28] sm:$0xff] }
  0x10   : > { %v234_v8 = vsub.s32 %v231_v6, %v233_v7 }
  0x11   : > { %241 = vperm.xlu0 %348, %v238_v2  }
  0x88   : > { %v228_v9 = vpop.permute.xlu0 %227 }
  0x89   : > { %v235_v10 = vrot.slane %v228_v9, %v234_v8 }
  0x8b   : > { %v237_v13 = vmul.f32 %v235_v10, %v223_v11 }
  0x8c   : > { %v242_v12 = vpop.permute.xlu0 %241 }
  0x8d   : > { %v249_v14 = vrot.slane %v242_v12, %v234_v8 }
  0x8f   : > { %v251_v15 = vadd.f32 %v249_v14, %v237_v13 }
  0x91   : > { %v252_v17 = vmax.f32 %v251_v15, 0.0 }
  0x93   : > { %v254_v18 = vadd.f32 %v253_v16, %v252_v17 }
  0x95   : > { %v255_v19 = vmax.f32 %v254_v18, 0.0 }
  0x97   : > { %256 = vst [vmem:[%s221_s5] sm:$0xff] %v255_v19 }
  0x98 PF: > { %s14_s15 = sadd.s32 1, %s355_s15  }
  0x99   : > { %p11_p4 = scmp.ge.s32.totalorder %s14_s15, 4  }
  0x9b   :  { %13 = sbr.rel (!%p11_p4) target bundleno = 1 (0x1), region = 69 }

// kernel: basic_block_forward.4
= control target key start
LH: loop header
LB: loop body
LE: loop exit
PB: predicated region body
PF: predicated region fallthrough
CT: control target
= control target key end

     0   :  { %v1794_v0 = vmov 0   ;;  %v1795_v4 = vmov 1   ;;  %v1796_v5 = vmov 2   ;;  %v1797_v6 = vmov 3   ;;  %s1819_s8 = smov 17   ;;  %s1821_s9 = smov 15   ;;  %s3014_s3 = inlined_call_operand.vmem [shape: f32[4,36], index: 3, kind: input, shape index: {}]   ;;  %s3015_s1 = inlined_call_operand.vmem [shape: f32[4,1], index: 1, kind: input, shape index: {}]   ;;  %s3016_s2 = inlined_call_operand.vmem [shape: f32[4,1], index: 2, kind: input, shape index: {}]   ;;  %s3017_s0 = inlined_call_operand.vmem [shape: f32[4,512], index: 0, kind: input, shape index: {}]   ;;  %s3018_s4 = inlined_call_operand.vmem [shape: f32[9,512], index: 4, kind: input, shape index: {}]   ;;  %s3019_s5 = inlined_call_operand.vmem [shape: f32[1,512], index: 5, kind: input, shape index: {}]   ;;  %s3020_s6 = inlined_call_operand.vmem [shape: f32[4,512], index: 6, kind: output, shape index: {0}]   ;;  %s3021_s7 = inlined_call_operand.vmem [shape: f32[1,4,2], index: 7, kind: output, shape index: {1}]  }
   0x1   :  { %1757 = vset.pattern.permute.xlu1 %v1794_v0  ;;  %1756 = vset.pattern.permute.xlu0 %v1794_v0  ;;  %v1882_v1 = vld [vmem:[%s3014_s3] sm:$0xf]  ;;  %v1798_v7 = vmov 4   ;;  %v1799_v8 = vmov 5   ;;  %v1800_v9 = vmov 6   ;;  %v1801_v10 = vmov 7  }
   0x2   :  { %v27_v2 = vld [vmem:[%s3015_s1] sm:$0xf]  ;;  %128 = vperm.xlu1 %1757, %v1882_v1   ;;  %v1802_v11 = vmov 8   ;;  %v1803_v12 = vmov 9   ;;  %v1804_v13 = vmov 10   ;;  %v1805_v14 = vmov 11  }
   0x3   :  { %30 = vperm.xlu0 %1756, %v27_v2   ;;  %v42_v3 = vld [vmem:[%s3016_s2] sm:$0xf]  ;;  %v1806_v15 = vmov 12   ;;  %v1807_v16 = vmov 13   ;;  %v1808_v17 = vmov 14   ;;  %v1809_v18 = vmov 15  }
   0x4   :  { %v1810_v19 = vmov 17   ;;  %v1811_v20 = vmov 16   ;;  %v1812_v21 = vmov 22   ;;  %v1813_v22 = vmov 18   ;;  %v25_v36 = vld [vmem:[%s3017_s0] sm:$0xff]  ;;  %v26_v37 = vld [vmem:[%s3017_s0 + $0x8] sm:$0xff] }
   0x5   :  { %v1814_v23 = vmov 19   ;;  %v1815_v24 = vmov 20   ;;  %v1816_v25 = vmov 21   ;;  %v1817_v26 = vmov 23   ;;  %s1820_s0 = smov 16   ;;  %v1959_v54 = vld [vmem:[%s3018_s4] sm:$0xff] }
   0x6   :  { %1758 = vset.pattern.permute.xlu1 %v1795_v4  ;;  %v1818_v27 = vmov 839922192   ;;  %v35_v29 = vlaneseq  ;;  %v1964_v55 = vld [vmem:[%s3018_s4 + $0x8] sm:$0xff]  ;;  %s1822_s14 = smov 1   ;;  %v1973_v56 = vld [vmem:[%s3018_s4 + $0x10] sm:$0xff]  ;;  %v1978_v57 = vld [vmem:[%s3018_s4 + $0x18] sm:$0xff] }
   0x7   :  { %45 = vperm.xlu0 %1756, %v42_v3   ;;  %160 = vperm.xlu1 %1758, %v1882_v1   ;;  %v33_v28 = vunpack.c.l.s4 %v1818_v27  ;;  %s1823_s19 = smov 127   ;;  %s1824_s20 = smov 113   ;;  %vm81_vm0 = vcmask 138240   ;;  %vm248_vm1 = vcmask 130048   ;;  %vm981_vm2 = vcmask 1039360  }
   0x8   :  { %v1912_v31 = vshrl.u32 %v35_v29, 7  ;;  %s1831_s21 = smov 112   ;;  %s1833_s22 = smov 111   ;;  %vm1147_vm3 = vcmask 924672   ;;  %vm414_vm4 = vcmask 121856   ;;  %vm580_vm5 = vcmask 7168  }
   0x9   :  { %v34_v30 = vunpack.c.0.s8 %v33_v28  ;;  %vm1313_vm6 = vcmask 916480   ;;  %vm1479_vm7 = vcmask 908288   ;;  %vm1673_vm8 = vcmask 1043456  }
   0xa   :  { %v1954_v53 = vsub.s32 4, %v1912_v31  ;;  %v2064_v27 = vsub.s32 3, %v1912_v31  ;;  %v2070_v29 = vsub.s32 7, %v1912_v31  ;;  %vm1697_vm9 = vcmask 11264  }
   0xb   :  { %1759 = vset.pattern.permute.xlu0 %v1796_v5  ;;  %1760 = vset.pattern.permute.xlu1 %v1797_v6  ;;  %v37_v32 = vsub.s32 %v34_v30, %v1912_v31  ;;  %v2008_v6 = vsub.s32 1, %v1912_v31 }
   0xc   :  { %192 = vperm.xlu0 %1759, %v1882_v1   ;;  %224 = vperm.xlu1 %1760, %v1882_v1   ;;  %v740_v61 = vrot.slane %v1959_v54, %v1954_v53  ;;  %v744_v62 = vrot.slane %v1964_v55, %v1954_v53  ;;  %v748_v63 = vrot.slane %v1973_v56, %v1954_v53 }
   0xd   :  { %v752_v0 = vrot.slane %v1978_v57, %v1954_v53 }
   0xe   :  { %v757_v3 = vcombine.low %v740_v61, %v744_v62 }
   0xf   :  { %v758_v5 = vcombine.low %v748_v63, %v752_v0 }
  0x10   :  { %1761 = vset.pattern.permute.xlu0 %v1798_v7  ;;  %1762 = vset.pattern.permute.xlu1 %v1799_v8 }
  0x11   :  { %294 = vperm.xlu0 %1761, %v1882_v1   ;;  %326 = vperm.xlu1 %1762, %v1882_v1  }
  0x15   :  { %1763 = vset.pattern.permute.xlu0 %v1800_v9  ;;  %1764 = vset.pattern.permute.xlu1 %v1801_v10  ;;  %v2018_v9 = vsub.s32 0, %v1912_v31 }
  0x16   :  { %358 = vperm.xlu0 %1763, %v1882_v1   ;;  %390 = vperm.xlu1 %1764, %v1882_v1  }
  0x17   :  { %v105_v63 = vrot.slane %v1978_v57, %v2018_v9 }
  0x1a   :  { %1765 = vset.pattern.permute.xlu0 %v1802_v11  ;;  %1766 = vset.pattern.permute.xlu1 %v1803_v12  ;;  %v2023_v11 = vsub.s32 5, %v1912_v31 }
  0x1b   :  { %460 = vperm.xlu0 %1765, %v1882_v1   ;;  %492 = vperm.xlu1 %1766, %v1882_v1  }
  0x1c   :  { %3056 = vst [vmem:[#allocation6_spill] sm:$0xff] %v2023_v11 }
  0x1f   :  { %1767 = vset.pattern.permute.xlu0 %v1804_v13  ;;  %1768 = vset.pattern.permute.xlu1 %v1805_v14  ;;  %v1825_v14 = vmov 25  }
  0x20   :  { %524 = vperm.xlu0 %1767, %v1882_v1   ;;  %556 = vperm.xlu1 %1768, %v1882_v1  }
  0x24   :  { %1769 = vset.pattern.permute.xlu0 %v1806_v15  ;;  %1770 = vset.pattern.permute.xlu1 %v1807_v16 }
  0x25   :  { %626 = vperm.xlu0 %1769, %v1882_v1   ;;  %658 = vperm.xlu1 %1770, %v1882_v1  }
  0x29   :  { %1771 = vset.pattern.permute.xlu0 %v1808_v17  ;;  %1772 = vset.pattern.permute.xlu1 %v1809_v18 }
  0x2a   :  { %690 = vperm.xlu0 %1771, %v1882_v1   ;;  %722 = vperm.xlu1 %1772, %v1882_v1  }
  0x2e   :  { %1774 = vset.pattern.permute.xlu0 %v1810_v19  ;;  %1773 = vset.pattern.permute.xlu1 %v1811_v20 }
  0x2f   :  { %854 = vperm.xlu0 %1774, %v1882_v1   ;;  %802 = vperm.xlu1 %1773, %v1882_v1  }
  0x33   :  { %1779 = vset.pattern.permute.xlu0 %v1812_v21  ;;  %1775 = vset.pattern.permute.xlu1 %v1813_v22 }
  0x34   :  { %906 = vperm.xlu1 %1775, %v1882_v1  }
  0x38   :  { %1776 = vset.pattern.permute.xlu1 %v1814_v23 }
  0x39   :  { %958 = vperm.xlu1 %1776, %v1882_v1  }
  0x3d   :  { %1777 = vset.pattern.permute.xlu1 %v1815_v24  ;;  %v2056_v24 = vsub.s32 2, %v1912_v31 }
  0x3e   :  { %1028 = vperm.xlu1 %1777, %v1882_v1  }
  0x42   :  { %1778 = vset.pattern.permute.xlu1 %v1816_v25 }
  0x43   :  { %1060 = vperm.xlu1 %1778, %v1882_v1  }
  0x47   :  { %1780 = vset.pattern.permute.xlu1 %v1817_v26  ;;  %v2061_v26 = vsub.s32 6, %v1912_v31 }
  0x7d   :  { %v1915_v34 = vpop.permute.xlu1 %128 }
  0x7e   :  { %v31_v33 = vpop.permute.xlu0 %30 }
  0x7f   :  { %v38_v35 = vrot.slane %v31_v33, %v37_v32 }
  0x81   :  { %v40_v39 = vmul.f32 %v38_v35, %v25_v36  ;;  %v41_v40 = vmul.f32 %v38_v35, %v26_v37  ;;  %v1826_v36 = vmov 24  }
  0x82   :  { %v46_v38 = vpop.permute.xlu0 %45  ;;  %v1923_v42 = vpop.permute.xlu1 %160 }
  0x83   :  { %v53_v41 = vrot.slane %v46_v38, %v37_v32 }
  0x85   :  { %v55_v43 = vadd.f32 %v53_v41, %v40_v39  ;;  %v56_v44 = vadd.f32 %v53_v41, %v41_v40 }
  0x87   :  { %v1925_v45 = vmax.f32 %v55_v43, 0.0  ;;  %v1927_v46 = vmax.f32 %v56_v44, 0.0  ;;  %v1929_v47 = vpop.permute.xlu0 %192  ;;  %v1931_v48 = vpop.permute.xlu1 %224 }
  0x89   :  { %79 = vrot.lane.b32.xlu0 %v1927_v46, %s1819_s8  ;;  %75 = vrot.lane.b32.xlu1 %v1925_v45, %s1819_s8  ;;  %v1984_v59 = vcombine.high %v1927_v46, %v1927_v46  ;;  %v2012_v7 = vcombine.high %v1925_v45, %v1925_v45  ;;  %v2015_v8 = vmul.f32 %v757_v3, %v1925_v45 }
  0x8a   :  { %v2026_v12 = vmul.f32 %v758_v5, %v1927_v46 }
  0x8b   :  { %v820_v15 = vrot.slane %v2015_v8, %v2008_v6  ;;  %v824_v16 = vrot.slane %v2015_v8, %v2023_v11  ;;  %v768_v19 = vrot.slane %v2015_v8, %v2018_v9  ;;  %v772_v21 = vrot.slane %v2015_v8, %v1954_v53 }
  0x8c   :  { %v1937_v49 = vpop.permute.xlu0 %294  ;;  %v1943_v50 = vpop.permute.xlu1 %326  ;;  %v828_v17 = vrot.slane %v2026_v12, %v2008_v6  ;;  %v832_v18 = vrot.slane %v2026_v12, %v2023_v11  ;;  %v776_v22 = vrot.slane %v2026_v12, %v2018_v9  ;;  %v780_v23 = vrot.slane %v2026_v12, %v1954_v53 }
  0x8d   :  { %242 = vrot.lane.b32.xlu0 %v1925_v45, %s1820_s0  ;;  %246 = vrot.lane.b32.xlu1 %v1927_v46, %s1820_s0  ;;  %v2067_v28 = vrot.slane %v820_v15, %v2008_v6  ;;  %v2073_v30 = vrot.slane %v824_v16, %v2008_v6  ;;  %v2082_v35 = vrot.slane %v768_v19, %v2018_v9  ;;  %v1827_v16 = vmov 27  }
  0x8e   :  { %v2076_v32 = vrot.slane %v828_v17, %v2008_v6  ;;  %v2079_v33 = vrot.slane %v832_v18, %v2008_v6  ;;  %v2086_v37 = vrot.slane %v772_v21, %v2018_v9  ;;  %v2089_v31 = vrot.slane %v776_v22, %v2018_v9 }
  0x8f   :  { %v2092_v38 = vrot.slane %v780_v23, %v2018_v9  ;;  %v872_v40 = vrot.slane %v2015_v8, %v2056_v24  ;;  %v876_v41 = vrot.slane %v2015_v8, %v2061_v26  ;;  %v880_v43 = vrot.slane %v2026_v12, %v2056_v24 }
  0x90   :  { %v884_v44 = vrot.slane %v2026_v12, %v2061_v26  ;;  %v1828_v17 = vmov 26   ;;  %v1830_v15 = vmov 28  }
  0x91   :  { %408 = vrot.lane.b32.xlu0 %v1925_v45, %s1821_s9  ;;  %412 = vrot.lane.b32.xlu1 %v1927_v46, %s1821_s9  ;;  %v1949_v51 = vpop.permute.xlu0 %358  ;;  %v1951_v52 = vpop.permute.xlu1 %390  ;;  %v2126_v18 = vrot.slane %v872_v40, %v2056_v24  ;;  %v2129_v19 = vrot.slane %v876_v41, %v2056_v24  ;;  %v2132_v21 = vrot.slane %v880_v43, %v2056_v24 }
  0x92   :  { %v2135_v22 = vrot.slane %v884_v44, %v2056_v24  ;;  %v932_v40 = vrot.slane %v2026_v12, %v2064_v27  ;;  %v936_v41 = vrot.slane %v2026_v12, %v2070_v29 }
  0x94   :  { %v2166_v44 = vrot.slane %v932_v40, %v2064_v27 }
  0x95   :  { %574 = vrot.lane.b32.xlu0 %v1925_v45, %s1822_s14  ;;  %578 = vrot.lane.b32.xlu1 %v1927_v46, %s1822_s14 }
  0x96   :  { %v1980_v58 = vpop.permute.xlu0 %460  ;;  %v1986_v60 = vpop.permute.xlu1 %492 }
  0x97   :  { %3052 = vst [vmem:[#allocation2_spill] sm:$0xff] %v1986_v60 }
  0x99   :  { %973 = vrot.lane.b32.xlu0 %v1925_v45, %s1823_s19  ;;  %70 = vrot.lane.b32.xlu1 %v1984_v59, %s1819_s8 }
  0x9b   :  { %v2000_v2 = vpop.permute.xlu0 %524  ;;  %v2002_v4 = vpop.permute.xlu1 %556 }
  0x9c   :  { %3053 = vst [vmem:[#allocation3_spill] sm:$0xff] %v2000_v2  ;;  %3054 = vst [vmem:[#allocation4_spill] sm:$0xff] %v2002_v4 }
  0x9d   :  { %977 = vrot.lane.b32.xlu0 %v1927_v46, %s1823_s19  ;;  %1124 = vperm.xlu1 %1780, %v1882_v1  }
  0xa0   :  { %v2020_v10 = vpop.permute.xlu0 %626  ;;  %v2032_v13 = vpop.permute.xlu1 %658 }
  0xa1   :  { %3055 = vst [vmem:[#allocation5_spill] sm:$0xff] %v2020_v10  ;;  %1139 = vrot.lane.b32.xlu1 %v1925_v45, %s1824_s20  ;;  %77 = vrot.lane.b32.xlu0 %v2012_v7, %s1819_s8  ;;  %3057 = vst [vmem:[#allocation7_spill] sm:$0xff] %v2032_v13  ;;  %v97_v13 = vrot.slane %v1964_v55, %v2018_v9  ;;  %v101_v10 = vrot.slane %v1973_v56, %v2018_v9 }
  0xa2   :  { %1782 = vset.pattern.permute.xlu1 %v1825_v14 }
  0xa5   :  { %1143 = vrot.lane.b32.xlu1 %v1927_v46, %s1824_s20  ;;  %1092 = vperm.xlu0 %1779, %v1882_v1   ;;  %v2047_v20 = vpop.permute.xlu0 %690  ;;  %v2058_v25 = vpop.permute.xlu1 %722 }
  0xa6   :  { %3058 = vst [vmem:[#allocation8_spill] sm:$0xff] %v2047_v20  ;;  %3059 = vst [vmem:[#allocation9_spill] sm:$0xff] %v2058_v25 }
  0xa9   :  { %1226 = vperm.xlu1 %1782, %v1882_v1   ;;  %1781 = vset.pattern.permute.xlu0 %v1826_v36  ;;  %v924_v36 = vrot.slane %v2015_v8, %v2064_v27 }
  0xaa   :  { %v2094_v39 = vpop.permute.xlu0 %854  ;;  %1194 = vperm.xlu0 %1781, %v1882_v1   ;;  %v2113_v0 = vpop.permute.xlu1 %802 }
  0xab   :  { %v2160_v12 = vrot.slane %v924_v36, %v2064_v27  ;;  %v3066_v2 = vsub.f32 %v2076_v32, %v2094_v39 }
  0xad   :  { %1784 = vset.pattern.permute.xlu1 %v1827_v16  ;;  %v928_v16 = vrot.slane %v2015_v8, %v2070_v29  ;;  %v1829_v8 = vmov 29   ;;  %v2265_v60 = vand.u32 2147483647, %v3066_v2 }
  0xae   :  { %1290 = vperm.xlu1 %1784, %v1882_v1   ;;  %1783 = vset.pattern.permute.xlu0 %v1828_v17  ;;  %v2169_v17 = vrot.slane %v936_v41, %v2064_v27  ;;  %v1834_v41 = vmov 32  }
  0xaf   :  { %1258 = vperm.xlu0 %1783, %v1882_v1   ;;  %v2137_v23 = vpop.permute.xlu1 %906  ;;  %v2163_v43 = vrot.slane %v928_v16, %v2064_v27  ;;  %3067 = vst [vmem:[#allocation14_spill] sm:$0xff] %v2265_v60 }
  0xb2   :  { %239 = vrot.lane.b32.xlu1 %v1984_v59, %s1820_s0 }
  0xb3   :  { %979 = vrot.lane.b32.xlu0 %v1984_v59, %s1823_s19  ;;  %1786 = vset.pattern.permute.xlu1 %v1829_v8  ;;  %v1835_v8 = vmov 34  }
  0xb4   :  { %1785 = vset.pattern.permute.xlu0 %v1830_v15  ;;  %v2171_v14 = vpop.permute.xlu1 %958  ;;  %v1832_v15 = vmov 30  }
  0xb6   :  { %244 = vrot.lane.b32.xlu1 %v2012_v7, %s1820_s0 }
  0xb7   :  { %1141 = vrot.lane.b32.xlu0 %v2012_v7, %s1824_s20 }
  0xba   :  { %405 = vrot.lane.b32.xlu1 %v1984_v59, %s1821_s9 }
  0xbb   :  { %1307 = vrot.lane.b32.xlu0 %v2012_v7, %s1831_s21 }
  0xbe   :  { %410 = vrot.lane.b32.xlu1 %v2012_v7, %s1821_s9 }
  0xbf   :  { %1360 = vperm.xlu0 %1785, %v1882_v1  }
  0xc2   :  { %571 = vrot.lane.b32.xlu1 %v1984_v59, %s1822_s14 }
  0xc3   :  { %1787 = vset.pattern.permute.xlu0 %v1832_v15  ;;  %v1836_v15 = vmov 35  }
  0xc4   :  { %1424 = vperm.xlu0 %1787, %v1882_v1  }
  0xc6   :  { %576 = vrot.lane.b32.xlu1 %v2012_v7, %s1822_s14 }
  0xc8   :  { %1473 = vrot.lane.b32.xlu0 %v2012_v7, %s1833_s22 }
  0xc9   :  { %1789 = vset.pattern.permute.xlu0 %v1834_v41  ;;  %v1837_v41 = vmov 31  }
  0xca   :  { %1305 = vrot.lane.b32.xlu1 %v1925_v45, %s1831_s21 }
  0xcc   :  { %1526 = vperm.xlu0 %1789, %v1882_v1  }
  0xce   :  { %1309 = vrot.lane.b32.xlu1 %v1927_v46, %s1831_s21 }
  0xd0   :  { %1791 = vset.pattern.permute.xlu0 %v1835_v8  ;;  %v1838_v8 = vmov 33  }
  0xd1   :  { %1590 = vperm.xlu0 %1791, %v1882_v1  }
  0xd2   :  { %975 = vrot.lane.b32.xlu1 %v2012_v7, %s1823_s19  ;;  %v2211_v7 = vpop.permute.xlu1 %1028 }
  0xd5   :  { %1793 = vset.pattern.permute.xlu0 %v1836_v15 }
  0xd6   :  { %1145 = vrot.lane.b32.xlu1 %v1984_v59, %s1824_s20  ;;  %v2214_v40 = vpop.permute.xlu1 %1060 }
  0xda   :  { %1311 = vrot.lane.b32.xlu1 %v1984_v59, %s1831_s21 }
  0xde   :  { %1392 = vperm.xlu1 %1786, %v1882_v1  }
  0xe2   :  { %1788 = vset.pattern.permute.xlu1 %v1837_v41 }
  0xe3   :  { %1456 = vperm.xlu1 %1788, %v1882_v1  }
  0xe7   :  { %1471 = vrot.lane.b32.xlu1 %v1925_v45, %s1833_s22 }
  0xe8   :  { %1790 = vset.pattern.permute.xlu1 %v1838_v8 }
  0xeb   :  { %1475 = vrot.lane.b32.xlu1 %v1927_v46, %s1833_s22 }
  0xef   :  { %1477 = vrot.lane.b32.xlu1 %v1984_v59, %s1833_s22 }
  0xf3   :  { %1558 = vperm.xlu1 %1790, %v1882_v1  }
  0xf7   :  { %1792 = vset.pattern.permute.xlu1 %v1836_v15 }
  0xf8   :  { %1622 = vperm.xlu1 %1792, %v1882_v1   ;;  %v93_v1 = vrot.slane %v1959_v54, %v2018_v9 }
  0xfb   :  { %v80_v41 = vpop.permute.xlu0 %79  ;;  %v76_v16 = vpop.permute.xlu1 %75 }
  0xff   :  { %v2217_v36 = vpop.permute.xlu0 %242  ;;  %v2219_v45 = vpop.permute.xlu1 %246 }
 0x103   :  { %v2221_v8 = vpop.permute.xlu0 %408  ;;  %v2223_v46 = vpop.permute.xlu1 %412 }
 0x107   :  { %v2225_v59 = vpop.permute.xlu0 %574  ;;  %v2227_v5 = vpop.permute.xlu1 %578 }
 0x108   :  { %3060 = vst [vmem:[#allocation10_spill] sm:$0xff] %v2225_v59  ;;  %3061 = vst [vmem:[#allocation11_spill] sm:$0xff] %v2227_v5  ;;  %v3063_v5 = vsub.f32 %v2067_v28, %v2094_v39 }
 0x10a   :  { %v2250_v4 = vand.u32 2147483647, %v3063_v5 }
 0x10b   :  { %v2229_v3 = vpop.permute.xlu0 %973  ;;  %v71_v15 = vpop.permute.xlu1 %70 }
 0x10c   :  { %v84_v62 = vsel %vm81_vm0, %v80_v41, %v71_v15  ;;  %v89_v61 = vsel %vm81_vm0, %v71_v15, %v76_v16 }
 0x10d   :  { %v2239_v25 = vmul.f32 %v93_v1, %v89_v61  ;;  %v2241_v20 = vmul.f32 %v105_v63, %v84_v62  ;;  %v3064_v63 = vsub.f32 %v2073_v30, %v2094_v39  ;;  %v3069_v30 = vsub.f32 %v2082_v35, %v2113_v0 }
 0x10e   :  { %v3070_v61 = vsub.f32 %v2086_v37, %v2113_v0  ;;  %v3077_v37 = vsub.f32 %v2129_v19, %v2137_v23 }
 0x10f   :  { %v2237_v53 = vpop.permute.xlu0 %977  ;;  %v2260_v1 = vand.u32 2147483647, %v3064_v63  ;;  %v113_v28 = vrot.slane %v2239_v25, %v2018_v9  ;;  %v125_v5 = vrot.slane %v2241_v20, %v2018_v9  ;;  %v2279_v63 = vand.u32 2147483647, %v3069_v30 }
 0x110   :  { %3062 = vst [vmem:[#allocation12_spill] sm:$0xff] %v2237_v53  ;;  %v2287_v60 = vand.u32 2147483647, %v3070_v61 }
 0x111   :  { %3065 = vst [vmem:[#allocation13_spill] sm:$0xff] %v2260_v1  ;;  %v3072_v1 = vsub.f32 %v2089_v31, %v2113_v0  ;;  %v3079_v31 = vsub.f32 %v2132_v21, %v2137_v23  ;;  %v131_v61 = vsub.f32 %v113_v28, %v1915_v34  ;;  %v134_v19 = vsub.f32 %v125_v5, %v1915_v34 }
 0x112   :  { %3071 = vst [vmem:[#allocation15_spill] sm:$0xff] %v2287_v60  ;;  %v3082_v21 = vsub.f32 %v2160_v12, %v2171_v14  ;;  %v3086_v28 = vsub.f32 %v2166_v44, %v2171_v14  ;;  %v3088_v12 = vsub.f32 %v2169_v17, %v2171_v14 }
 0x113   :  { %v78_v59 = vpop.permute.xlu0 %77  ;;  %v135_v17 = vand.u32 2147483647, %v131_v61 }
 0x114   :  { %v82_v15 = vsel %vm81_vm0, %v76_v16, %v78_v59  ;;  %v3068_v16 = vsub.f32 %v2079_v33, %v2094_v39  ;;  %v83_v32 = vsel %vm81_vm0, %v78_v59, %v80_v41  ;;  %v2292_v33 = vand.u32 2147483647, %v3072_v1 }
 0x115   :  { %v2282_v2 = vmul.f32 %v97_v13, %v82_v15  ;;  %v3074_v39 = vsub.f32 %v2092_v38, %v2113_v0  ;;  %v3075_v13 = vsub.f32 %v2126_v18, %v2137_v23  ;;  %v2309_v59 = vand.u32 2147483647, %v3077_v37 }
 0x116   :  { %v2274_v62 = vand.u32 2147483647, %v3068_v16  ;;  %3073 = vst [vmem:[#allocation16_spill] sm:$0xff] %v2292_v33  ;;  %v2299_v16 = vmul.f32 %v101_v10, %v83_v32  ;;  %v2314_v15 = vand.u32 2147483647, %v3079_v31  ;;  %v3081_v0 = vsub.f32 %v2135_v22, %v2137_v23 }
 0x117   :  { %v2297_v35 = vand.u32 2147483647, %v3074_v39  ;;  %v2304_v41 = vand.u32 2147483647, %v3075_v13  ;;  %3078 = vst [vmem:[#allocation18_spill] sm:$0xff] %v2309_v59  ;;  %v117_v38 = vrot.slane %v2282_v2, %v2018_v9  ;;  %v3084_v32 = vsub.f32 %v2163_v43, %v2171_v14 }
 0x118   :  { %3080 = vst [vmem:[#allocation19_spill] sm:$0xff] %v2314_v15  ;;  %v2318_v10 = vpop.permute.xlu1 %1124  ;;  %v2323_v18 = vand.u32 2147483647, %v3081_v0  ;;  %v121_v1 = vrot.slane %v2299_v16, %v2018_v9  ;;  %v2332_v30 = vand.u32 2147483647, %v3082_v21  ;;  %v146_v43 = vrot.slane %v2239_v25, %v2008_v6 }
 0x119   :  { %3076 = vst [vmem:[#allocation17_spill] sm:$0xff] %v2304_v41  ;;  %v2337_v39 = vand.u32 2147483647, %v3084_v32  ;;  %v2346_v5 = vand.u32 2147483647, %v3086_v28  ;;  %v158_v37 = vrot.slane %v2241_v20, %v2008_v6  ;;  %v132_v31 = vsub.f32 %v117_v38, %v1915_v34 }
 0x11a   :  { %3083 = vst [vmem:[#allocation20_spill] sm:$0xff] %v2332_v30  ;;  %v2351_v13 = vand.u32 2147483647, %v3088_v12  ;;  %v133_v0 = vsub.f32 %v121_v1, %v1915_v34  ;;  %v138_v32 = vand.u32 2147483647, %v134_v19  ;;  %v150_v38 = vrot.slane %v2282_v2, %v2008_v6 }
 0x11b   :  { %3085 = vst [vmem:[#allocation21_spill] sm:$0xff] %v2337_v39  ;;  %3087 = vst [vmem:[#allocation22_spill] sm:$0xff] %v2346_v5  ;;  %v154_v34 = vrot.slane %v2299_v16, %v2008_v6  ;;  %v163_v61 = vsub.f32 %v146_v43, %v1923_v42  ;;  %v166_v19 = vsub.f32 %v158_v37, %v1923_v42  ;;  %v136_v44 = vand.u32 2147483647, %v132_v31 }
 0x11c   :  { %3089 = vst [vmem:[#allocation23_spill] sm:$0xff] %v2351_v13  ;;  %v2359_v21 = vpop.permute.xlu1 %1139  ;;  %v178_v28 = vrot.slane %v2239_v25, %v2056_v24  ;;  %v190_v12 = vrot.slane %v2241_v20, %v2056_v24  ;;  %v137_v23 = vand.u32 2147483647, %v133_v0  ;;  %v139_v14 = vsub.f32 0.0, %v135_v17 }
 0x11d   :  { %v142_v37 = vsub.f32 0.0, %v138_v32  ;;  %v210_v5 = vrot.slane %v2239_v25, %v2064_v27  ;;  %v182_v59 = vrot.slane %v2282_v2, %v2056_v24  ;;  %v222_v31 = vrot.slane %v2241_v20, %v2064_v27 }
 0x11e   :  { %v164_v0 = vsub.f32 %v150_v38, %v1923_v42  ;;  %v165_v15 = vsub.f32 %v154_v34, %v1923_v42  ;;  %v186_v1 = vrot.slane %v2299_v16, %v2056_v24  ;;  %v167_v33 = vand.u32 2147483647, %v163_v61 }
 0x11f   :  { %v170_v43 = vand.u32 2147483647, %v166_v19  ;;  %v195_v17 = vsub.f32 %v178_v28, %v1929_v47  ;;  %v198_v32 = vsub.f32 %v190_v12, %v1929_v47  ;;  %v140_v25 = vsub.f32 0.0, %v136_v44 }
 0x120   :  { %v2383_v22 = vpop.permute.xlu1 %1143  ;;  %v2385_v39 = vpop.permute.xlu0 %1092  ;;  %v141_v60 = vsub.f32 0.0, %v137_v23  ;;  %v171_v38 = vsub.f32 %v139_v14, %v167_v33  ;;  %v196_v61 = vsub.f32 %v182_v59, %v1929_v47  ;;  %v214_v28 = vrot.slane %v2282_v2, %v2064_v27 }
 0x121   :  { %v174_v34 = vsub.f32 %v142_v37, %v170_v43  ;;  %v168_v44 = vand.u32 2147483647, %v164_v0  ;;  %v169_v23 = vand.u32 2147483647, %v165_v15  ;;  %v197_v19 = vsub.f32 %v186_v1, %v1929_v47 }
 0x122   :  { %v218_v13 = vrot.slane %v2299_v16, %v2064_v27  ;;  %v199_v20 = vand.u32 2147483647, %v195_v17  ;;  %v202_v41 = vand.u32 2147483647, %v198_v32  ;;  %v227_v42 = vsub.f32 %v210_v5, %v1931_v48 }
 0x123   :  { %v230_v33 = vsub.f32 %v222_v31, %v1931_v48  ;;  %v172_v14 = vsub.f32 %v140_v25, %v168_v44  ;;  %v173_v59 = vsub.f32 %v141_v60, %v169_v23  ;;  %v200_v1 = vand.u32 2147483647, %v196_v61 }
 0x124   :  { %v2403_v30 = vpop.permute.xlu1 %1226  ;;  %v203_v15 = vsub.f32 %v171_v38, %v199_v20  ;;  %v206_v37 = vsub.f32 %v174_v34, %v202_v41  ;;  %v201_v31 = vand.u32 2147483647, %v197_v19  ;;  %v228_v60 = vsub.f32 %v214_v28, %v1931_v48 }
 0x125   :  { %3090 = vst [vmem:[#allocation24_spill] sm:$0xff] %v2403_v30  ;;  %v2412_v12 = vpop.permute.xlu0 %1194  ;;  %v229_v0 = vsub.f32 %v218_v13, %v1931_v48  ;;  %v231_v32 = vand.u32 2147483647, %v227_v42  ;;  %v234_v25 = vand.u32 2147483647, %v230_v33  ;;  %v204_v38 = vsub.f32 %v172_v14, %v200_v1 }
 0x126   :  { %v205_v34 = vsub.f32 %v173_v59, %v201_v31  ;;  %v232_v19 = vand.u32 2147483647, %v228_v60  ;;  %v3094_v31 = vrot.slane %v1978_v57, %v2008_v6 }
 0x127   :  { %v235_v44 = vsub.f32 %v203_v15, %v231_v32  ;;  %v238_v48 = vsub.f32 %v206_v37, %v234_v25  ;;  %v233_v33 = vand.u32 2147483647, %v229_v0  ;;  %v3093_v15 = vrot.slane %v1959_v54, %v2008_v6 }
 0x128   :  { %v2459_v0 = vsub.f32 %v204_v38, %v232_v19 }
 0x129   :  { %v2423_v47 = vpop.permute.xlu1 %1290  ;;  %v2461_v23 = vsub.f32 %v205_v34, %v233_v33 }
 0x12a   :  { %3091 = vst [vmem:[#allocation25_spill] sm:$0xff] %v2423_v47  ;;  %v2431_v17 = vpop.permute.xlu0 %1258 }
 0x12b   :  { %3092 = vst [vmem:[#allocation26_spill] sm:$0xff] %v2431_v17 }
 0x12d   :  { %v240_v13 = vpop.permute.xlu1 %239 }
 0x12e   :  { %v251_v14 = vsel %vm248_vm1, %v2219_v45, %v240_v13  ;;  %v256_v59 = vsel %vm248_vm1, %v240_v13, %v2217_v36  ;;  %v980_v1 = vpop.permute.xlu0 %979  ;;  %v3095_v13 = vrot.slane %v1973_v56, %v2023_v11 }
 0x12f   :  { %v273_v37 = vmul.f32 %v3093_v15, %v256_v59  ;;  %v276_v32 = vmul.f32 %v3094_v31, %v251_v14  ;;  %v984_v25 = vsel %vm981_vm2, %v2237_v53, %v980_v1  ;;  %v990_v60 = vsel %vm981_vm2, %v980_v1, %v2229_v3 }
 0x130   :  { %v1009_v42 = vmul.f32 %v3095_v13, %v984_v25  ;;  %v3096_v59 = vrot.slane %v1978_v57, %v2023_v11 }
 0x131   :  { %v280_v14 = vrot.slane %v273_v37, %v2018_v9  ;;  %v292_v31 = vrot.slane %v276_v32, %v2018_v9  ;;  %v312_v28 = vrot.slane %v273_v37, %v2008_v6  ;;  %v324_v1 = vrot.slane %v276_v32, %v2008_v6 }
 0x132   :  { %v1010_v15 = vmul.f32 %v3096_v59, %v990_v60  ;;  %v344_v38 = vrot.slane %v273_v37, %v2056_v24  ;;  %v356_v34 = vrot.slane %v276_v32, %v2056_v24  ;;  %v376_v19 = vrot.slane %v273_v37, %v2064_v27 }
 0x133   :  { %v388_v33 = vrot.slane %v276_v32, %v2064_v27  ;;  %v297_v25 = vsub.f32 %v280_v14, %v1937_v49  ;;  %v300_v60 = vsub.f32 %v292_v31, %v1937_v49  ;;  %v329_v13 = vsub.f32 %v312_v28, %v1943_v50 }
 0x134   :  { %v332_v59 = vsub.f32 %v324_v1, %v1943_v50  ;;  %v361_v61 = vsub.f32 %v344_v38, %v1949_v51  ;;  %v364_v20 = vsub.f32 %v356_v34, %v1949_v51  ;;  %v393_v41 = vsub.f32 %v376_v19, %v1951_v52 }
 0x135   :  { %v396_v5 = vsub.f32 %v388_v33, %v1951_v52  ;;  %v301_v37 = vand.u32 2147483647, %v297_v25  ;;  %v304_v16 = vand.u32 2147483647, %v300_v60  ;;  %v333_v32 = vand.u32 2147483647, %v329_v13 }
 0x136   :  { %v1022_v14 = vrot.slane %v1009_v42, %v2018_v9  ;;  %v336_v43 = vand.u32 2147483647, %v332_v59  ;;  %v365_v31 = vand.u32 2147483647, %v361_v61  ;;  %v368_v2 = vand.u32 2147483647, %v364_v20 }
 0x137   :  { %v1026_v28 = vrot.slane %v1010_v15, %v2018_v9  ;;  %v305_v1 = vsub.f32 %v235_v44, %v301_v37  ;;  %v308_v11 = vsub.f32 %v238_v48, %v304_v16  ;;  %v397_v38 = vand.u32 2147483647, %v393_v41 }
 0x138   :  { %v400_v53 = vand.u32 2147483647, %v396_v5  ;;  %v2488_v34 = vsub.f32 %v1022_v14, %v2211_v7  ;;  %v1054_v33 = vrot.slane %v1009_v42, %v2008_v6  ;;  %v1058_v25 = vrot.slane %v1010_v15, %v2008_v6 }
 0x139   :  { %v2491_v19 = vsub.f32 %v1026_v28, %v2211_v7  ;;  %v337_v60 = vsub.f32 %v305_v1, %v333_v32  ;;  %v340_v13 = vsub.f32 %v308_v11, %v336_v43  ;;  %v1086_v20 = vrot.slane %v1009_v42, %v2056_v24  ;;  %v245_v43 = vpop.permute.xlu1 %244 }
 0x13a   :  { %v1090_v61 = vrot.slane %v1010_v15, %v2056_v24  ;;  %v2500_v41 = vsub.f32 %v1054_v33, %v2214_v40  ;;  %v2503_v44 = vsub.f32 %v1058_v25, %v2214_v40  ;;  %v1118_v28 = vrot.slane %v1009_v42, %v2064_v27  ;;  %v1142_v33 = vpop.permute.xlu0 %1141 }
 0x13b   :  { %v369_v48 = vsub.f32 %v337_v60, %v365_v31  ;;  %v372_v59 = vsub.f32 %v340_v13, %v368_v2  ;;  %v2506_v37 = vsub.f32 %v1086_v20, %v2385_v39  ;;  %v1122_v1 = vrot.slane %v1010_v15, %v2064_v27 }
 0x13c   :  { %v2509_v11 = vsub.f32 %v1090_v61, %v2385_v39  ;;  %v2522_v13 = vsub.f32 %v1118_v28, %v2318_v10  ;;  %v249_v42 = vsel %vm248_vm1, %v2217_v36, %v245_v43  ;;  %v250_v15 = vsel %vm248_vm1, %v245_v43, %v2219_v45 }
 0x13d   :  { %3097 = vst [vmem:[#allocation27_spill] sm:$0xff] %v2506_v37  ;;  %v2515_v25 = vsub.f32 %v369_v48, %v397_v38  ;;  %v2517_v31 = vsub.f32 %v372_v59, %v400_v53  ;;  %v2525_v20 = vsub.f32 %v1122_v1, %v2318_v10  ;;  %v3101_v53 = vrot.slane %v1964_v55, %v2008_v6  ;;  %v406_v2 = vpop.permute.xlu1 %405 }
 0x13e   :  { %3098 = vst [vmem:[#allocation28_spill] sm:$0xff] %v2509_v11  ;;  %3099 = vst [vmem:[#allocation29_spill] sm:$0xff] %v2522_v13  ;;  %v3102_v61 = vrot.slane %v1973_v56, %v2008_v6  ;;  %v1148_v59 = vsel %vm1147_vm3, %v2359_v21, %v1142_v33  ;;  %v1149_v28 = vsel %vm1147_vm3, %v1142_v33, %v2383_v22 }
 0x13f   :  { %3100 = vst [vmem:[#allocation30_spill] sm:$0xff] %v2525_v20  ;;  %v274_v38 = vmul.f32 %v3101_v53, %v249_v42  ;;  %v3103_v45 = vrot.slane %v1959_v54, %v2061_v26  ;;  %v3104_v42 = vrot.slane %v1964_v55, %v2061_v26 }
 0x140   :  { %v275_v48 = vmul.f32 %v3102_v61, %v250_v15 }
 0x141   :  { %v1173_v43 = vmul.f32 %v3103_v45, %v1148_v59  ;;  %v1174_v53 = vmul.f32 %v3104_v42, %v1149_v28  ;;  %v284_v15 = vrot.slane %v274_v38, %v2018_v9  ;;  %v316_v60 = vrot.slane %v274_v38, %v2008_v6 }
 0x142   :  { %v288_v61 = vrot.slane %v275_v48, %v2018_v9  ;;  %v320_v33 = vrot.slane %v275_v48, %v2008_v6  ;;  %v348_v1 = vrot.slane %v274_v38, %v2056_v24  ;;  %v352_v36 = vrot.slane %v275_v48, %v2056_v24 }
 0x143   :  { %v380_v14 = vrot.slane %v274_v38, %v2064_v27  ;;  %v384_v59 = vrot.slane %v275_v48, %v2064_v27  ;;  %v298_v45 = vsub.f32 %v284_v15, %v1937_v49  ;;  %v330_v42 = vsub.f32 %v316_v60, %v1943_v50 }
 0x144   :  { %v299_v28 = vsub.f32 %v288_v61, %v1937_v49  ;;  %v331_v32 = vsub.f32 %v320_v33, %v1943_v50  ;;  %v362_v5 = vsub.f32 %v348_v1, %v1949_v51  ;;  %v363_v16 = vsub.f32 %v352_v36, %v1949_v51  ;;  %v411_v36 = vpop.permute.xlu1 %410 }
 0x145   :  { %v394_v20 = vsub.f32 %v380_v14, %v1951_v52  ;;  %v395_v13 = vsub.f32 %v384_v59, %v1951_v52  ;;  %v302_v38 = vand.u32 2147483647, %v298_v45  ;;  %v334_v48 = vand.u32 2147483647, %v330_v42 }
 0x146   :  { %v303_v11 = vand.u32 2147483647, %v299_v28  ;;  %v1180_v15 = vrot.slane %v1173_v43, %v2018_v9  ;;  %v335_v37 = vand.u32 2147483647, %v331_v32  ;;  %v366_v49 = vand.u32 2147483647, %v362_v5 }
 0x147   :  { %v367_v61 = vand.u32 2147483647, %v363_v16  ;;  %v1184_v60 = vrot.slane %v1174_v53, %v2018_v9  ;;  %v306_v50 = vsub.f32 %v2459_v0, %v302_v38  ;;  %v398_v33 = vand.u32 2147483647, %v394_v20 }
 0x148   :  { %v307_v1 = vsub.f32 %v2461_v23, %v303_v11  ;;  %v399_v51 = vand.u32 2147483647, %v395_v13  ;;  %v2570_v14 = vsub.f32 %v1180_v15, %v2412_v12  ;;  %v1212_v59 = vrot.slane %v1173_v43, %v2008_v6  ;;  %v3118_v11 = vld [vmem:[#allocation3_spill] sm:$0xff] }
 0x149   :  { %v2573_v52 = vsub.f32 %v1184_v60, %v2412_v12  ;;  %v1216_v5 = vrot.slane %v1174_v53, %v2008_v6  ;;  %v338_v16 = vsub.f32 %v306_v50, %v334_v48  ;;  %v1244_v45 = vrot.slane %v1173_v43, %v2056_v24 }
 0x14a   :  { %3105 = vst [vmem:[#allocation31_spill] sm:$0xff] %v2570_v14  ;;  %v339_v32 = vsub.f32 %v307_v1, %v335_v37  ;;  %v1248_v0 = vrot.slane %v1174_v53, %v2056_v24  ;;  %v2582_v13 = vsub.f32 %v1212_v59, %v2403_v30  ;;  %v1276_v60 = vrot.slane %v1173_v43, %v2064_v27 }
 0x14b   :  { %3106 = vst [vmem:[#allocation32_spill] sm:$0xff] %v2573_v52  ;;  %v2585_v20 = vsub.f32 %v1216_v5, %v2403_v30  ;;  %v370_v28 = vsub.f32 %v338_v16, %v366_v49  ;;  %v2588_v38 = vsub.f32 %v1244_v45, %v2431_v17  ;;  %v1280_v50 = vrot.slane %v1174_v53, %v2064_v27  ;;  %v2603_v5 = vpop.permute.xlu1 %571 }
 0x14c   :  { %3107 = vst [vmem:[#allocation33_spill] sm:$0xff] %v2582_v13  ;;  %v371_v42 = vsub.f32 %v339_v32, %v367_v61  ;;  %v2591_v37 = vsub.f32 %v1248_v0, %v2431_v17  ;;  %v2606_v16 = vsub.f32 %v1276_v60, %v2423_v47  ;;  %v417_v43 = vsel %vm414_vm4, %v2223_v46, %v406_v2 }
 0x14d   :  { %3108 = vst [vmem:[#allocation34_spill] sm:$0xff] %v2585_v20  ;;  %3109 = vst [vmem:[#allocation35_spill] sm:$0xff] %v2588_v38  ;;  %v2597_v1 = vsub.f32 %v370_v28, %v398_v33  ;;  %v2609_v32 = vsub.f32 %v1280_v50, %v2423_v47  ;;  %v422_v53 = vsel %vm414_vm4, %v406_v2, %v2221_v8 }
 0x14e   :  { %3110 = vst [vmem:[#allocation36_spill] sm:$0xff] %v2591_v37  ;;  %v2599_v59 = vsub.f32 %v371_v42, %v399_v51  ;;  %3111 = vst [vmem:[#allocation37_spill] sm:$0xff] %v2606_v16  ;;  %v3113_v33 = vrot.slane %v1959_v54, %v2056_v24  ;;  %v3114_v45 = vrot.slane %v1978_v57, %v2056_v24  ;;  %v3119_v16 = vld [vmem:[#allocation4_spill] sm:$0xff] }
 0x14f   :  { %3112 = vst [vmem:[#allocation38_spill] sm:$0xff] %v2609_v32  ;;  %v415_v28 = vsel %vm414_vm4, %v2221_v8, %v411_v36  ;;  %v416_v42 = vsel %vm414_vm4, %v411_v36, %v2223_v46  ;;  %v3115_v2 = vrot.slane %v1964_v55, %v2056_v24  ;;  %v577_v48 = vpop.permute.xlu1 %576 }
 0x150   :  { %v439_v51 = vmul.f32 %v3113_v33, %v422_v53  ;;  %v442_v0 = vmul.f32 %v3114_v45, %v417_v43  ;;  %v3116_v53 = vrot.slane %v1973_v56, %v2056_v24 }
 0x151   :  { %v2630_v61 = vmul.f32 %v3115_v2, %v415_v28 }
 0x152   :  { %v2635_v33 = vmul.f32 %v3116_v53, %v416_v42  ;;  %v446_v43 = vrot.slane %v439_v51, %v2018_v9  ;;  %v458_v8 = vrot.slane %v442_v0, %v2018_v9  ;;  %v478_v46 = vrot.slane %v439_v51, %v2008_v6  ;;  %v3117_v53 = vld [vmem:[#allocation2_spill] sm:$0xff] }
 0x153   :  { %v490_v36 = vrot.slane %v442_v0, %v2008_v6  ;;  %v510_v45 = vrot.slane %v439_v51, %v2056_v24  ;;  %v522_v50 = vrot.slane %v442_v0, %v2056_v24  ;;  %v542_v28 = vrot.slane %v439_v51, %v2064_v27 }
 0x154   :  { %v554_v2 = vrot.slane %v442_v0, %v2064_v27  ;;  %v463_v60 = vsub.f32 %v446_v43, %v1980_v58  ;;  %v466_v42 = vsub.f32 %v458_v8, %v1980_v58  ;;  %v495_v49 = vsub.f32 %v478_v46, %v3117_v53 }
 0x155   :  { %v498_v15 = vsub.f32 %v490_v36, %v3117_v53  ;;  %v527_v23 = vsub.f32 %v510_v45, %v3118_v11  ;;  %v530_v32 = vsub.f32 %v522_v50, %v3118_v11  ;;  %v559_v37 = vsub.f32 %v542_v28, %v3119_v16 }
 0x156   :  { %v562_v38 = vsub.f32 %v554_v2, %v3119_v16  ;;  %v467_v51 = vand.u32 2147483647, %v463_v60  ;;  %v470_v0 = vand.u32 2147483647, %v466_v42  ;;  %v499_v20 = vand.u32 2147483647, %v495_v49 }
 0x157   :  { %v450_v43 = vrot.slane %v2630_v61, %v2018_v9  ;;  %v502_v8 = vand.u32 2147483647, %v498_v15  ;;  %v531_v46 = vand.u32 2147483647, %v527_v23  ;;  %v534_v13 = vand.u32 2147483647, %v530_v32 }
 0x158   :  { %v454_v36 = vrot.slane %v2635_v33, %v2018_v9  ;;  %v471_v45 = vsub.f32 %v2515_v25, %v467_v51  ;;  %v474_v50 = vsub.f32 %v2517_v31, %v470_v0  ;;  %v563_v28 = vand.u32 2147483647, %v559_v37 }
 0x159   :  { %v566_v47 = vand.u32 2147483647, %v562_v38  ;;  %v464_v60 = vsub.f32 %v450_v43, %v1980_v58  ;;  %v482_v2 = vrot.slane %v2630_v61, %v2008_v6  ;;  %v486_v23 = vrot.slane %v2635_v33, %v2008_v6  ;;  %v2669_v38 = vpop.permute.xlu1 %1305 }
 0x15a   :  { %v465_v49 = vsub.f32 %v454_v36, %v1980_v58  ;;  %v503_v15 = vsub.f32 %v471_v45, %v499_v20  ;;  %v506_v32 = vsub.f32 %v474_v50, %v502_v8  ;;  %v514_v25 = vrot.slane %v2630_v61, %v2056_v24 }
 0x15b   :  { %v518_v31 = vrot.slane %v2635_v33, %v2056_v24  ;;  %v468_v37 = vand.u32 2147483647, %v464_v60  ;;  %v496_v58 = vsub.f32 %v482_v2, %v3117_v53  ;;  %v497_v51 = vsub.f32 %v486_v23, %v3117_v53 }
 0x15c   :  { %v469_v42 = vand.u32 2147483647, %v465_v49  ;;  %v535_v0 = vsub.f32 %v503_v15, %v531_v46  ;;  %v538_v43 = vsub.f32 %v506_v32, %v534_v13  ;;  %v528_v36 = vsub.f32 %v514_v25, %v3118_v11  ;;  %v3121_v46 = vld [vmem:[#allocation10_spill] sm:$0xff]  ;;  %v1308_v32 = vpop.permute.xlu0 %1307 }
 0x15d   :  { %v529_v20 = vsub.f32 %v518_v31, %v3118_v11  ;;  %v472_v8 = vsub.f32 %v2597_v1, %v468_v37  ;;  %v500_v50 = vand.u32 2147483647, %v496_v58  ;;  %v501_v17 = vand.u32 2147483647, %v497_v51  ;;  %v3120_v11 = vld [vmem:[#allocation11_spill] sm:$0xff] }
 0x15e   :  { %v473_v45 = vsub.f32 %v2599_v59, %v469_v42  ;;  %v567_v52 = vsub.f32 %v535_v0, %v563_v28  ;;  %v570_v14 = vsub.f32 %v538_v43, %v566_v47  ;;  %v532_v60 = vand.u32 2147483647, %v528_v36  ;;  %v2691_v28 = vpop.permute.xlu1 %1309 }
 0x15f   :  { %v533_v49 = vand.u32 2147483647, %v529_v20  ;;  %v504_v30 = vsub.f32 %v472_v8, %v500_v50  ;;  %v546_v53 = vrot.slane %v2630_v61, %v2064_v27  ;;  %v550_v13 = vrot.slane %v2635_v33, %v2064_v27 }
 0x160   :  { %v505_v2 = vsub.f32 %v473_v45, %v501_v17  ;;  %v583_v1 = vsel %vm580_vm5, %v3120_v11, %v2603_v5  ;;  %v588_v59 = vsel %vm580_vm5, %v2603_v5, %v3121_v46  ;;  %v581_v47 = vsel %vm580_vm5, %v3121_v46, %v577_v48 }
 0x161   :  { %v582_v17 = vsel %vm580_vm5, %v577_v48, %v3120_v11  ;;  %v536_v61 = vsub.f32 %v504_v30, %v532_v60  ;;  %v560_v33 = vsub.f32 %v546_v53, %v3119_v16  ;;  %v561_v15 = vsub.f32 %v550_v13, %v3119_v16  ;;  %v3126_v53 = vld [vmem:[#allocation5_spill] sm:$0xff] }
 0x162   :  { %v537_v23 = vsub.f32 %v505_v2, %v533_v49  ;;  %v3122_v25 = vrot.slane %v1959_v54, %v2064_v27  ;;  %v3123_v5 = vrot.slane %v1978_v57, %v2064_v27  ;;  %v3124_v48 = vrot.slane %v1964_v55, %v2064_v27 }
 0x163   :  { %v3125_v30 = vrot.slane %v1973_v56, %v2064_v27  ;;  %v564_v16 = vand.u32 2147483647, %v560_v33  ;;  %v565_v51 = vand.u32 2147483647, %v561_v15  ;;  %v2713_v0 = vsel %vm1313_vm6, %v2669_v38, %v1308_v32 }
 0x164   :  { %v605_v31 = vmul.f32 %v3122_v25, %v588_v59  ;;  %v608_v37 = vmul.f32 %v3123_v5, %v583_v1  ;;  %v2704_v42 = vmul.f32 %v3124_v48, %v581_v47  ;;  %v2717_v43 = vsel %vm1313_vm6, %v1308_v32, %v2691_v28  ;;  %v3127_v1 = vld [vmem:[#allocation7_spill] sm:$0xff]  ;;  %v3128_v47 = vld [vmem:[#allocation8_spill] sm:$0xff] }
 0x165   :  { %v2709_v58 = vmul.f32 %v3125_v30, %v582_v17  ;;  %v568_v50 = vsub.f32 %v536_v61, %v564_v16  ;;  %v569_v60 = vsub.f32 %v537_v23, %v565_v51  ;;  %v3129_v51 = vld [vmem:[#allocation9_spill] sm:$0xff] }
 0x166   :  { %v612_v36 = vrot.slane %v605_v31, %v2018_v9  ;;  %v624_v20 = vrot.slane %v608_v37, %v2018_v9  ;;  %v644_v8 = vrot.slane %v605_v31, %v2008_v6  ;;  %v656_v45 = vrot.slane %v608_v37, %v2008_v6 }
 0x167   :  { %v676_v49 = vrot.slane %v605_v31, %v2056_v24  ;;  %v688_v2 = vrot.slane %v608_v37, %v2056_v24  ;;  %v708_v15 = vrot.slane %v605_v31, %v2064_v27  ;;  %v720_v61 = vrot.slane %v608_v37, %v2064_v27 }
 0x168   :  { %v629_v13 = vsub.f32 %v612_v36, %v3126_v53  ;;  %v632_v11 = vsub.f32 %v624_v20, %v3126_v53  ;;  %v661_v46 = vsub.f32 %v644_v8, %v3127_v1  ;;  %v664_v59 = vsub.f32 %v656_v45, %v3127_v1 }
 0x169   :  { %v693_v17 = vsub.f32 %v676_v49, %v3128_v47  ;;  %v696_v33 = vsub.f32 %v688_v2, %v3128_v47  ;;  %v616_v5 = vrot.slane %v2704_v42, %v2018_v9  ;;  %v725_v36 = vsub.f32 %v708_v15, %v3129_v51 }
 0x16a   :  { %v633_v23 = vand.u32 2147483647, %v629_v13  ;;  %v636_v32 = vand.u32 2147483647, %v632_v11  ;;  %v665_v25 = vand.u32 2147483647, %v661_v46  ;;  %v728_v45 = vsub.f32 %v720_v61, %v3129_v51 }
 0x16b   :  { %v668_v48 = vand.u32 2147483647, %v664_v59  ;;  %v697_v30 = vand.u32 2147483647, %v693_v17  ;;  %v700_v16 = vand.u32 2147483647, %v696_v33  ;;  %v620_v31 = vrot.slane %v2709_v58, %v2018_v9 }
 0x16c   :  { %v637_v20 = vsub.f32 %v567_v52, %v633_v23  ;;  %v640_v8 = vsub.f32 %v570_v14, %v636_v32  ;;  %v729_v49 = vand.u32 2147483647, %v725_v36  ;;  %v630_v37 = vsub.f32 %v616_v5, %v3126_v53 }
 0x16d   :  { %v648_v2 = vrot.slane %v2704_v42, %v2008_v6  ;;  %v652_v13 = vrot.slane %v2709_v58, %v2008_v6  ;;  %v732_v59 = vand.u32 2147483647, %v728_v45  ;;  %v631_v52 = vsub.f32 %v620_v31, %v3126_v53 }
 0x16e   :  { %v669_v11 = vsub.f32 %v637_v20, %v665_v25  ;;  %v672_v46 = vsub.f32 %v640_v8, %v668_v48  ;;  %v634_v14 = vand.u32 2147483647, %v630_v37  ;;  %v680_v15 = vrot.slane %v2704_v42, %v2056_v24 }
 0x16f   :  { %v662_v17 = vsub.f32 %v648_v2, %v3127_v1  ;;  %v663_v33 = vsub.f32 %v652_v13, %v3127_v1  ;;  %v635_v32 = vand.u32 2147483647, %v631_v52  ;;  %v684_v5 = vrot.slane %v2709_v58, %v2056_v24  ;;  %v976_v1 = vpop.permute.xlu1 %975 }
 0x170   :  { %v701_v61 = vsub.f32 %v669_v11, %v697_v30  ;;  %v704_v23 = vsub.f32 %v672_v46, %v700_v16  ;;  %v638_v36 = vsub.f32 %v568_v50, %v634_v14  ;;  %v694_v20 = vsub.f32 %v680_v15, %v3128_v47 }
 0x171   :  { %v666_v25 = vand.u32 2147483647, %v662_v17  ;;  %v667_v48 = vand.u32 2147483647, %v663_v33  ;;  %v639_v45 = vsub.f32 %v569_v60, %v635_v32  ;;  %v695_v31 = vsub.f32 %v684_v5, %v3128_v47 }
 0x172   :  { %v733_v53 = vsub.f32 %v701_v61, %v729_v49  ;;  %v736_v8 = vsub.f32 %v704_v23, %v732_v59  ;;  %v698_v2 = vand.u32 2147483647, %v694_v20  ;;  %v712_v30 = vrot.slane %v2704_v42, %v2064_v27  ;;  %v3132_v61 = vld [vmem:[#allocation17_spill] sm:$0xff]  ;;  %v3134_v20 = vld [vmem:[#allocation23_spill] sm:$0xff] }
 0x173   :  { %v670_v37 = vsub.f32 %v638_v36, %v666_v25  ;;  %v716_v16 = vrot.slane %v2709_v58, %v2064_v27  ;;  %v671_v11 = vsub.f32 %v639_v45, %v667_v48  ;;  %v699_v46 = vand.u32 2147483647, %v695_v31  ;;  %v3133_v25 = vld [vmem:[#allocation12_spill] sm:$0xff]  ;;  %v3136_v45 = vld [vmem:[#allocation6_spill] sm:$0xff] }
 0x174   :  { %v813_v50 = vsub.f32 %v733_v53, %v2279_v63  ;;  %v816_v13 = vsub.f32 %v736_v8, %v2297_v35  ;;  %v726_v60 = vsub.f32 %v712_v30, %v3129_v51  ;;  %v3130_v59 = vrot.slane %v1959_v54, %v2070_v29 }
 0x175   :  { %v702_v49 = vsub.f32 %v670_v37, %v698_v2  ;;  %v727_v47 = vsub.f32 %v716_v16, %v3129_v51  ;;  %v703_v63 = vsub.f32 %v671_v11, %v699_v46  ;;  %v3131_v35 = vrot.slane %v1964_v55, %v2070_v29  ;;  %v3139_v16 = vld [vmem:[#allocation15_spill] sm:$0xff] }
 0x176   :  { %v2765_v52 = vmul.f32 %v3130_v59, %v2713_v0  ;;  %v865_v42 = vsub.f32 %v813_v50, %v2250_v4  ;;  %v868_v58 = vsub.f32 %v816_v13, %v2274_v62  ;;  %v730_v17 = vand.u32 2147483647, %v726_v60  ;;  %v3140_v13 = vld [vmem:[#allocation16_spill] sm:$0xff]  ;;  %v3142_v59 = vld [vmem:[#allocation14_spill] sm:$0xff] }
 0x177   :  { %v2773_v14 = vmul.f32 %v3131_v35, %v2717_v43  ;;  %v731_v33 = vand.u32 2147483647, %v727_v47  ;;  %v1146_v43 = vpop.permute.xlu1 %1145  ;;  %v982_v36 = vsel %vm981_vm2, %v2229_v3, %v976_v1  ;;  %v983_v48 = vsel %vm981_vm2, %v976_v1, %v3133_v25 }
 0x178   :  { %v1346_v51 = vrot.slane %v2765_v52, %v2018_v9  ;;  %v1410_v0 = vrot.slane %v2765_v52, %v2056_v24  ;;  %v920_v15 = vsub.f32 %v868_v58, %v2323_v18  ;;  %v917_v23 = vsub.f32 %v865_v42, %v3132_v61  ;;  %v3135_v18 = vld [vmem:[#allocation20_spill] sm:$0xff]  ;;  %v3144_v61 = vld [vmem:[#allocation18_spill] sm:$0xff] }
 0x179   :  { %v1350_v4 = vrot.slane %v2773_v14, %v2018_v9  ;;  %v1414_v62 = vrot.slane %v2773_v14, %v2056_v24  ;;  %v734_v32 = vsub.f32 %v702_v49, %v730_v17  ;;  %v735_v5 = vsub.f32 %v703_v63, %v731_v33  ;;  %v3143_v33 = vld [vmem:[#allocation19_spill] sm:$0xff] }
 0x17a   :  { %v972_v53 = vsub.f32 %v920_v15, %v3134_v20  ;;  %v969_v8 = vsub.f32 %v917_v23, %v3135_v18  ;;  %v3137_v31 = vrot.slane %v1959_v54, %v3136_v45  ;;  %v3138_v2 = vrot.slane %v1964_v55, %v3136_v45  ;;  %v3141_v55 = vld [vmem:[#allocation13_spill] sm:$0xff]  ;;  %v3145_v20 = vld [vmem:[#allocation22_spill] sm:$0xff] }
 0x17b   :  { %v814_v50 = vsub.f32 %v734_v32, %v3139_v16  ;;  %v815_v11 = vsub.f32 %v735_v5, %v3140_v13  ;;  %v1150_v3 = vsel %vm1147_vm3, %v2383_v22, %v1146_v43  ;;  %v1156_v1 = vsel %vm1147_vm3, %v1146_v43, %v2359_v21 }
 0x17c   :  { %v1007_v37 = vmul.f32 %v3137_v31, %v982_v36  ;;  %v1008_v30 = vmul.f32 %v3138_v2, %v983_v48 }
 0x17d   :  { %v866_v47 = vsub.f32 %v814_v50, %v3141_v55  ;;  %v867_v42 = vsub.f32 %v815_v11, %v3142_v59 }
 0x17e   :  { %v1014_v46 = vrot.slane %v1007_v37, %v2018_v9  ;;  %v1018_v49 = vrot.slane %v1008_v30, %v2018_v9  ;;  %v1046_v54 = vrot.slane %v1007_v37, %v2008_v6  ;;  %v1050_v60 = vrot.slane %v1008_v30, %v2008_v6 }
 0x17f   :  { %v1078_v58 = vrot.slane %v1007_v37, %v2056_v24  ;;  %v1082_v63 = vrot.slane %v1008_v30, %v2056_v24  ;;  %v919_v15 = vsub.f32 %v867_v42, %v3143_v33  ;;  %v918_v23 = vsub.f32 %v866_v47, %v3144_v61  ;;  %v3153_v33 = vld [vmem:[#allocation27_spill] sm:$0xff] }
 0x180   :  { %v1031_v22 = vsub.f32 %v1014_v46, %v2211_v7  ;;  %v1032_v21 = vsub.f32 %v1018_v49, %v2211_v7  ;;  %v1063_v35 = vsub.f32 %v1046_v54, %v2214_v40  ;;  %v1064_v17 = vsub.f32 %v1050_v60, %v2214_v40  ;;  %v3146_v7 = vld [vmem:[#allocation21_spill] sm:$0xff]  ;;  %v1312_v40 = vpop.permute.xlu1 %1311 }
 0x181   :  { %v1095_v43 = vsub.f32 %v1078_v58, %v2385_v39  ;;  %v1096_v32 = vsub.f32 %v1082_v63, %v2385_v39  ;;  %v1110_v48 = vrot.slane %v1007_v37, %v2064_v27  ;;  %v971_v18 = vsub.f32 %v919_v15, %v3145_v20  ;;  %v3158_v20 = vld [vmem:[#allocation29_spill] sm:$0xff] }
 0x182   :  { %v1035_v5 = vand.u32 2147483647, %v1031_v22  ;;  %v1036_v36 = vand.u32 2147483647, %v1032_v21  ;;  %v1067_v25 = vand.u32 2147483647, %v1063_v35  ;;  %v970_v45 = vsub.f32 %v918_v23, %v3146_v7 }
 0x183   :  { %v1068_v31 = vand.u32 2147483647, %v1064_v17  ;;  %v1099_v2 = vand.u32 2147483647, %v1095_v43  ;;  %v1100_v50 = vand.u32 2147483647, %v1096_v32  ;;  %v1114_v13 = vrot.slane %v1008_v30, %v2064_v27 }
 0x184   :  { %v1039_v16 = vsub.f32 %v969_v8, %v1035_v5  ;;  %v1127_v11 = vsub.f32 %v1110_v48, %v2318_v10  ;;  %v1040_v46 = vsub.f32 %v970_v45, %v1036_v36  ;;  %v3147_v39 = vand.u32 2147483647, %v2488_v34  ;;  %v2847_v43 = vpop.permute.xlu1 %1392  ;;  %v3157_v36 = vld [vmem:[#allocation24_spill] sm:$0xff]  ;;  %v3160_v45 = vld [vmem:[#allocation30_spill] sm:$0xff] }
 0x185   :  { %v3148_v54 = vand.u32 2147483647, %v2491_v19  ;;  %v3149_v60 = vrot.slane %v1973_v56, %v2061_v26  ;;  %v1128_v59 = vsub.f32 %v1114_v13, %v2318_v10  ;;  %v3150_v30 = vrot.slane %v1978_v57, %v2061_v26 }
 0x186   :  { %v1041_v49 = vsub.f32 %v971_v18, %v3147_v39  ;;  %v1071_v47 = vsub.f32 %v1039_v16, %v1067_v25  ;;  %v1131_v8 = vand.u32 2147483647, %v1127_v11  ;;  %v1072_v58 = vsub.f32 %v1040_v46, %v1068_v31 }
 0x187   :  { %v1042_v37 = vsub.f32 %v972_v53, %v3148_v54  ;;  %v1175_v55 = vmul.f32 %v3149_v60, %v1150_v3  ;;  %v1176_v42 = vmul.f32 %v3150_v30, %v1156_v1  ;;  %v3151_v63 = vand.u32 2147483647, %v2500_v41  ;;  %v3155_v1 = vld [vmem:[#allocation28_spill] sm:$0xff] }
 0x188   :  { %v3152_v22 = vand.u32 2147483647, %v2503_v44  ;;  %v1103_v21 = vsub.f32 %v1071_v47, %v1099_v2  ;;  %v1132_v35 = vand.u32 2147483647, %v1128_v59  ;;  %v1104_v17 = vsub.f32 %v1072_v58, %v1100_v50  ;;  %v3162_v50 = vld [vmem:[#allocation31_spill] sm:$0xff] }
 0x189   :  { %v1073_v34 = vsub.f32 %v1041_v49, %v3151_v63  ;;  %v1188_v53 = vrot.slane %v1175_v55, %v2018_v9  ;;  %v1192_v3 = vrot.slane %v1176_v42, %v2018_v9  ;;  %v1220_v10 = vrot.slane %v1175_v55, %v2008_v6 }
 0x18a   :  { %v1074_v19 = vsub.f32 %v1042_v37, %v3152_v22  ;;  %v3154_v15 = vand.u32 2147483647, %v3153_v33  ;;  %v3156_v61 = vand.u32 2147483647, %v3155_v1  ;;  %v1135_v44 = vsub.f32 %v1103_v21, %v1131_v8 }
 0x18b   :  { %v1199_v41 = vsub.f32 %v1188_v53, %v2412_v12  ;;  %v1200_v32 = vsub.f32 %v1192_v3, %v2412_v12  ;;  %v1224_v5 = vrot.slane %v1176_v42, %v2008_v6  ;;  %v1231_v25 = vsub.f32 %v1220_v10, %v3157_v36  ;;  %v3164_v12 = vld [vmem:[#allocation32_spill] sm:$0xff]  ;;  %v2869_v3 = vpop.permute.xlu1 %1456 }
 0x18c   :  { %v1105_v26 = vsub.f32 %v1073_v34, %v3154_v15  ;;  %v1106_v23 = vsub.f32 %v1074_v19, %v3156_v61  ;;  %v1136_v48 = vsub.f32 %v1104_v17, %v1132_v35  ;;  %v3159_v18 = vand.u32 2147483647, %v3158_v20  ;;  %v1361_v34 = vpop.permute.xlu0 %1360  ;;  %v3166_v19 = vld [vmem:[#allocation26_spill] sm:$0xff]  ;;  %v3167_v17 = vld [vmem:[#allocation25_spill] sm:$0xff] }
 0x18d   :  { %v3161_v31 = vand.u32 2147483647, %v3160_v45  ;;  %v1203_v16 = vand.u32 2147483647, %v1199_v41  ;;  %v3163_v13 = vand.u32 2147483647, %v3162_v50  ;;  %v1232_v39 = vsub.f32 %v1224_v5, %v3157_v36 }
 0x18e   :  { %v1137_v7 = vsub.f32 %v1105_v26, %v3159_v18  ;;  %v1204_v46 = vand.u32 2147483647, %v1200_v32  ;;  %v1235_v49 = vand.u32 2147483647, %v1231_v25  ;;  %v3165_v54 = vand.u32 2147483647, %v3164_v12 }
 0x18f   :  { %v1138_v2 = vsub.f32 %v1106_v23, %v3161_v31  ;;  %v1205_v11 = vsub.f32 %v1135_v44, %v3163_v13  ;;  %v1252_v47 = vrot.slane %v1175_v55, %v2056_v24  ;;  %v1256_v59 = vrot.slane %v1176_v42, %v2056_v24  ;;  %v3170_v32 = vld [vmem:[#allocation33_spill] sm:$0xff]  ;;  %v3172_v25 = vld [vmem:[#allocation34_spill] sm:$0xff]  ;;  %v2911_v12 = vpop.permute.xlu1 %1471 }
 0x190   :  { %v1206_v37 = vsub.f32 %v1136_v48, %v3165_v54  ;;  %v1207_v60 = vsub.f32 %v1137_v7, %v1203_v16  ;;  %v1236_v30 = vand.u32 2147483647, %v1232_v39  ;;  %v1284_v58 = vrot.slane %v1175_v55, %v2064_v27  ;;  %v3174_v7 = vld [vmem:[#allocation35_spill] sm:$0xff]  ;;  %v1425_v13 = vpop.permute.xlu0 %1424  ;;  %v3178_v54 = vld [vmem:[#allocation37_spill] sm:$0xff] }
 0x191   :  { %v1208_v8 = vsub.f32 %v1138_v2, %v1204_v46  ;;  %v1288_v63 = vrot.slane %v1176_v42, %v2064_v27  ;;  %v1263_v53 = vsub.f32 %v1252_v47, %v3166_v19  ;;  %v1264_v21 = vsub.f32 %v1256_v59, %v3166_v19  ;;  %v3176_v2 = vld [vmem:[#allocation36_spill] sm:$0xff]  ;;  %v3180_v47 = vld [vmem:[#allocation38_spill] sm:$0xff] }
 0x192   :  { %v1239_v22 = vsub.f32 %v1207_v60, %v1235_v49  ;;  %v1316_v35 = vsel %vm1313_vm6, %v2691_v28, %v1312_v40  ;;  %v1295_v33 = vsub.f32 %v1284_v58, %v3167_v17  ;;  %v1322_v55 = vsel %vm1313_vm6, %v1312_v40, %v2669_v38 }
 0x193   :  { %v1240_v10 = vsub.f32 %v1208_v8, %v1236_v30  ;;  %v1296_v15 = vsub.f32 %v1288_v63, %v3167_v17  ;;  %v1267_v42 = vand.u32 2147483647, %v1263_v53  ;;  %v1268_v26 = vand.u32 2147483647, %v1264_v21 }
 0x194   :  { %v3168_v1 = vrot.slane %v1973_v56, %v2070_v29  ;;  %v3169_v28 = vrot.slane %v1978_v57, %v2070_v29  ;;  %v1299_v41 = vand.u32 2147483647, %v1295_v33  ;;  %v3171_v5 = vand.u32 2147483647, %v3170_v32 }
 0x195   :  { %v1300_v44 = vand.u32 2147483647, %v1296_v15  ;;  %v3173_v48 = vand.u32 2147483647, %v3172_v25  ;;  %v3175_v45 = vand.u32 2147483647, %v3174_v7  ;;  %v1272_v46 = vsub.f32 %v1240_v10, %v1268_v26 }
 0x196   :  { %v2878_v61 = vmul.f32 %v3168_v1, %v1316_v35  ;;  %v2883_v23 = vmul.f32 %v3169_v28, %v1322_v55  ;;  %v1237_v36 = vsub.f32 %v1205_v11, %v3171_v5  ;;  %v3177_v16 = vand.u32 2147483647, %v3176_v2  ;;  %v1474_v1 = vpop.permute.xlu0 %1473  ;;  %v1476_v5 = vpop.permute.xlu1 %1475 }
 0x197   :  { %v1238_v38 = vsub.f32 %v1206_v37, %v3173_v48  ;;  %v1271_v11 = vsub.f32 %v1239_v22, %v1267_v42  ;;  %v1363_v39 = vsub.f32 %v1346_v51, %v1361_v34  ;;  %v1364_v49 = vsub.f32 %v1350_v4, %v1361_v34 }
 0x198   :  { %v1354_v40 = vrot.slane %v2878_v61, %v2018_v9  ;;  %v1358_v56 = vrot.slane %v2883_v23, %v2018_v9  ;;  %v1418_v20 = vrot.slane %v2878_v61, %v2056_v24  ;;  %v1422_v57 = vrot.slane %v2883_v23, %v2056_v24 }
 0x199   :  { %v1386_v29 = vrot.slane %v2878_v61, %v2008_v6  ;;  %v1390_v18 = vrot.slane %v2883_v23, %v2008_v6  ;;  %v1269_v31 = vsub.f32 %v1237_v36, %v3175_v45  ;;  %v1270_v50 = vsub.f32 %v1238_v38, %v3177_v16 }
 0x19a   :  { %v3179_v37 = vand.u32 2147483647, %v3178_v54  ;;  %v3181_v59 = vand.u32 2147483647, %v3180_v47  ;;  %v1365_v30 = vsub.f32 %v1354_v40, %v1361_v34  ;;  %v1366_v58 = vsub.f32 %v1358_v56, %v1361_v34  ;;  %v1527_v16 = vpop.permute.xlu0 %1526 }
 0x19b   :  { %v1303_v63 = vsub.f32 %v1271_v11, %v1299_v41  ;;  %v1304_v22 = vsub.f32 %v1272_v46, %v1300_v44  ;;  %v1367_v19 = vand.u32 2147483647, %v1363_v39  ;;  %v1368_v53 = vand.u32 2147483647, %v1364_v49  ;;  %v1478_v49 = vpop.permute.xlu1 %1477 }
 0x19c   :  { %v1301_v60 = vsub.f32 %v1269_v31, %v3179_v37  ;;  %v1302_v8 = vsub.f32 %v1270_v50, %v3181_v59  ;;  %v1369_v51 = vand.u32 2147483647, %v1365_v30  ;;  %v1370_v21 = vand.u32 2147483647, %v1366_v58  ;;  %v1709_v59 = vld [vmem:[%s3018_s4 + $0x30] ss:$0 sm:$0xff] }
 0x19d   :  { %v1378_v4 = vrot.slane %v2765_v52, %v2008_v6  ;;  %v1382_v35 = vrot.slane %v2773_v14, %v2008_v6  ;;  %v1397_v33 = vsub.f32 %v1386_v29, %v2847_v43  ;;  %v1398_v15 = vsub.f32 %v1390_v18, %v2847_v43 }
 0x19e   :  { %v1371_v10 = vsub.f32 %v1301_v60, %v1367_v19  ;;  %v1372_v17 = vsub.f32 %v1302_v8, %v1368_v53  ;;  %v1373_v34 = vsub.f32 %v1303_v63, %v1369_v51  ;;  %v1374_v55 = vsub.f32 %v1304_v22, %v1370_v21 }
 0x19f   :  { %v1395_v42 = vsub.f32 %v1378_v4, %v2847_v43  ;;  %v1396_v26 = vsub.f32 %v1382_v35, %v2847_v43  ;;  %v1401_v28 = vand.u32 2147483647, %v1397_v33  ;;  %v1402_v41 = vand.u32 2147483647, %v1398_v15 }
 0x1a0   :  { %v1450_v44 = vrot.slane %v2878_v61, %v2064_v27  ;;  %v1454_v32 = vrot.slane %v2883_v23, %v2064_v27  ;;  %v1427_v48 = vsub.f32 %v1410_v0, %v1425_v13  ;;  %v1428_v43 = vsub.f32 %v1414_v62, %v1425_v13 }
 0x1a1   :  { %v1399_v36 = vand.u32 2147483647, %v1395_v42  ;;  %v1400_v25 = vand.u32 2147483647, %v1396_v26  ;;  %v1405_v38 = vsub.f32 %v1373_v34, %v1401_v28  ;;  %v1406_v40 = vsub.f32 %v1374_v55, %v1402_v41 }
 0x1a2   :  { %v1429_v56 = vsub.f32 %v1418_v20, %v1425_v13  ;;  %v1430_v29 = vsub.f32 %v1422_v57, %v1425_v13  ;;  %v1431_v7 = vand.u32 2147483647, %v1427_v48  ;;  %v1432_v45 = vand.u32 2147483647, %v1428_v43  ;;  %v1707_v57 = vld [vmem:[%s3018_s4 + $0x20] ss:$0 sm:$0xff] }
 0x1a3   :  { %v1403_v18 = vsub.f32 %v1371_v10, %v1399_v36  ;;  %v1404_v61 = vsub.f32 %v1372_v17, %v1400_v25  ;;  %v1442_v2 = vrot.slane %v2765_v52, %v2064_v27  ;;  %v1446_v0 = vrot.slane %v2773_v14, %v2064_v27  ;;  %v1708_v13 = vld [vmem:[%s3018_s4 + $0x28] ss:$0 sm:$0xff]  ;;  %v1591_v17 = vpop.permute.xlu0 %1590 }
 0x1a4   :  { %v1433_v23 = vand.u32 2147483647, %v1429_v56  ;;  %v1434_v31 = vand.u32 2147483647, %v1430_v29  ;;  %v1461_v62 = vsub.f32 %v1450_v44, %v2869_v3  ;;  %v1462_v20 = vsub.f32 %v1454_v32, %v2869_v3 }
 0x1a5   :  { %v1435_v50 = vsub.f32 %v1403_v18, %v1431_v7  ;;  %v1436_v11 = vsub.f32 %v1404_v61, %v1432_v45  ;;  %v1459_v39 = vsub.f32 %v1442_v2, %v2869_v3  ;;  %v1460_v14 = vsub.f32 %v1446_v0, %v2869_v3  ;;  %v1710_v3 = vld [vmem:[%s3018_s4 + $0x38] ss:$0 sm:$0xff] }
 0x1a6   :  { %v1437_v46 = vsub.f32 %v1405_v38, %v1433_v23  ;;  %v1438_v52 = vsub.f32 %v1406_v40, %v1434_v31  ;;  %v1465_v54 = vand.u32 2147483647, %v1461_v62  ;;  %v1466_v37 = vand.u32 2147483647, %v1462_v20 }
 0x1a7   :  { %v1480_v60 = vsel %vm1479_vm7, %v2911_v12, %v1474_v1  ;;  %v1481_v47 = vsel %vm1479_vm7, %v1474_v1, %v1476_v5  ;;  %v1463_v8 = vand.u32 2147483647, %v1459_v39  ;;  %v1464_v30 = vand.u32 2147483647, %v1460_v14 }
 0x1a8   :  { %v2955_v58 = vmul.f32 %v1707_v57, %v1480_v60  ;;  %v2957_v63 = vmul.f32 %v1708_v13, %v1481_v47  ;;  %v1469_v22 = vsub.f32 %v1437_v46, %v1465_v54  ;;  %v1470_v19 = vsub.f32 %v1438_v52, %v1466_v37 }
 0x1a9   :  { %v1482_v53 = vsel %vm1479_vm7, %v1476_v5, %v1478_v49  ;;  %v1488_v51 = vsel %vm1479_vm7, %v1478_v49, %v2911_v12  ;;  %v1467_v21 = vsub.f32 %v1435_v50, %v1463_v8  ;;  %v1468_v4 = vsub.f32 %v1436_v11, %v1464_v30  ;;  %v1559_v5 = vpop.permute.xlu1 %1558  ;;  %v1647_v8 = vld [vmem:[%s3019_s5] sm:$0xf] }
 0x1aa   :  { %v1512_v35 = vrot.slane %v2955_v58, %v2018_v9  ;;  %v1516_v10 = vrot.slane %v2957_v63, %v2018_v9  ;;  %v1576_v33 = vrot.slane %v2955_v58, %v2056_v24  ;;  %v1580_v15 = vrot.slane %v2957_v63, %v2056_v24 }
 0x1ab   :  { %v1507_v34 = vmul.f32 %v1709_v59, %v1482_v53  ;;  %v1508_v55 = vmul.f32 %v1710_v3, %v1488_v51  ;;  %v1544_v12 = vrot.slane %v2955_v58, %v2008_v6  ;;  %v1548_v1 = vrot.slane %v2957_v63, %v2008_v6 }
 0x1ac   :  { %v1529_v42 = vsub.f32 %v1512_v35, %v1527_v16  ;;  %v1530_v26 = vsub.f32 %v1516_v10, %v1527_v16  ;;  %v1593_v28 = vsub.f32 %v1576_v33, %v1591_v17  ;;  %v1594_v41 = vsub.f32 %v1580_v15, %v1591_v17 }
 0x1ad   :  { %v1520_v44 = vrot.slane %v1507_v34, %v2018_v9  ;;  %v1524_v32 = vrot.slane %v1508_v55, %v2018_v9  ;;  %v1584_v25 = vrot.slane %v1507_v34, %v2056_v24  ;;  %v1588_v48 = vrot.slane %v1508_v55, %v2056_v24 }
 0x1ae   :  { %v1533_v36 = vand.u32 2147483647, %v1529_v42  ;;  %v1552_v43 = vrot.slane %v1507_v34, %v2008_v6  ;;  %v1597_v38 = vand.u32 2147483647, %v1593_v28  ;;  %v1598_v40 = vand.u32 2147483647, %v1594_v41 }
 0x1af   :  { %v1556_v56 = vrot.slane %v1508_v55, %v2008_v6  ;;  %v1531_v29 = vsub.f32 %v1520_v44, %v1527_v16  ;;  %v1532_v61 = vsub.f32 %v1524_v32, %v1527_v16  ;;  %v1534_v7 = vand.u32 2147483647, %v1530_v26  ;;  %v1623_v16 = vpop.permute.xlu1 %1622 }
 0x1b0   :  { %v1537_v18 = vsub.f32 %v1467_v21, %v1533_v36  ;;  %v1561_v45 = vsub.f32 %v1544_v12, %v1559_v5  ;;  %v1562_v31 = vsub.f32 %v1548_v1, %v1559_v5  ;;  %v1563_v2 = vsub.f32 %v1552_v43, %v1559_v5 }
 0x1b1   :  { %v1535_v23 = vand.u32 2147483647, %v1531_v29  ;;  %v1564_v0 = vsub.f32 %v1556_v56, %v1559_v5  ;;  %v1536_v50 = vand.u32 2147483647, %v1532_v61  ;;  %v1538_v11 = vsub.f32 %v1468_v4, %v1534_v7 }
 0x1b2   :  { %v1565_v62 = vand.u32 2147483647, %v1561_v45  ;;  %v1616_v20 = vrot.slane %v1507_v34, %v2064_v27  ;;  %v1566_v13 = vand.u32 2147483647, %v1562_v31  ;;  %v1567_v46 = vand.u32 2147483647, %v1563_v2 }
 0x1b3   :  { %v1539_v57 = vsub.f32 %v1469_v22, %v1535_v23  ;;  %v1568_v52 = vand.u32 2147483647, %v1564_v0  ;;  %v1540_v39 = vsub.f32 %v1470_v19, %v1536_v50  ;;  %v1620_v49 = vrot.slane %v1508_v55, %v2064_v27 }
 0x1b4   :  { %v1569_v14 = vsub.f32 %v1537_v18, %v1565_v62  ;;  %v1595_v54 = vsub.f32 %v1584_v25, %v1591_v17  ;;  %v1570_v37 = vsub.f32 %v1538_v11, %v1566_v13  ;;  %v1596_v47 = vsub.f32 %v1588_v48, %v1591_v17 }
 0x1b5   :  { %v1571_v60 = vsub.f32 %v1539_v57, %v1567_v46  ;;  %v1608_v59 = vrot.slane %v2955_v58, %v2064_v27  ;;  %v1572_v30 = vsub.f32 %v1540_v39, %v1568_v52  ;;  %v1612_v19 = vrot.slane %v2957_v63, %v2064_v27 }
 0x1b6   :  { %v1599_v3 = vand.u32 2147483647, %v1595_v54  ;;  %v1601_v22 = vsub.f32 %v1569_v14, %v1597_v38  ;;  %v1600_v53 = vand.u32 2147483647, %v1596_v47  ;;  %v1602_v51 = vsub.f32 %v1570_v37, %v1598_v40 }
 0x1b7   :  { %v1625_v21 = vsub.f32 %v1608_v59, %v1623_v16  ;;  %v1627_v4 = vsub.f32 %v1616_v20, %v1623_v16  ;;  %v1626_v10 = vsub.f32 %v1612_v19, %v1623_v16  ;;  %v1628_v17 = vsub.f32 %v1620_v49, %v1623_v16 }
 0x1b8   :  { %v1603_v35 = vsub.f32 %v1571_v60, %v1599_v3  ;;  %v1652_v33 = vrot.slane %v1647_v8, %v2018_v9  ;;  %v1604_v58 = vsub.f32 %v1572_v30, %v1600_v53  ;;  %v1656_v55 = vrot.slane %v1647_v8, %v2008_v6 }
 0x1b9   :  { %v1629_v15 = vand.u32 2147483647, %v1625_v21  ;;  %v1631_v34 = vand.u32 2147483647, %v1627_v4  ;;  %v1630_v42 = vand.u32 2147483647, %v1626_v10  ;;  %v1660_v12 = vrot.slane %v1647_v8, %v2056_v24 }
 0x1ba   :  { %v1632_v26 = vand.u32 2147483647, %v1628_v17  ;;  %v1664_v63 = vrot.slane %v1647_v8, %v2064_v27 }
 0x1bb   :  { %v1633_v1 = vsub.f32 %v1601_v22, %v1629_v15  ;;  %v1635_v28 = vsub.f32 %v1603_v35, %v1631_v34  ;;  %v1634_v41 = vsub.f32 %v1602_v51, %v1630_v42 }
 0x1bc   :  { %v1636_v44 = vsub.f32 %v1604_v58, %v1632_v26 }
 0x1bd   :  { %v1669_v32 = vmul.f32 %v1652_v33, %v1633_v1  ;;  %v1671_v5 = vmul.f32 %v1660_v12, %v1635_v28  ;;  %v1641_v36 = vcombine.low %v1633_v1, %v1634_v41  ;;  %v1670_v25 = vmul.f32 %v1656_v55, %v1634_v41 }
 0x1be   :  { %v1642_v9 = vcombine.low %v1635_v28, %v1636_v44  ;;  %v1672_v48 = vmul.f32 %v1664_v63, %v1636_v44 }
 0x1bf   :  { %v1674_v43 = vsel %vm1673_vm8, %v1669_v32, 0.0  ;;  %v1683_v6 = vmul.f32 %v1669_v32, %v1633_v1  ;;  %v1685_v38 = vmul.f32 %v1671_v5, %v1635_v28  ;;  %1645 = vst [vmem:[%s3020_s6] sm:$0xff] %v1641_v36  ;;  %v1675_v24 = vsel %vm1673_vm8, %v1670_v25, 0.0 }
 0x1c0   :  { %1646 = vst [vmem:[%s3020_s6 + $0x8] sm:$0xff] %v1642_v9  ;;  %v1677_v27 = vsel %vm1673_vm8, %v1671_v5, 0.0  ;;  %v1684_v40 = vmul.f32 %v1670_v25, %v1634_v41  ;;  %v1676_v56 = vadd.f32 %v1675_v24, %v1674_v43  ;;  %v1686_v18 = vmul.f32 %v1672_v48, %v1636_v44 }
 0x1c1   :  { %v1687_v29 = vsel %vm1673_vm8, %v1683_v6, 0.0  ;;  %v1690_v7 = vsel %vm1673_vm8, %v1685_v38, 0.0  ;;  %v1679_v31 = vsel %vm1673_vm8, %v1672_v48, 0.0 }
 0x1c2   :  { %v1688_v61 = vsel %vm1673_vm8, %v1684_v40, 0.0  ;;  %v1678_v45 = vadd.f32 %v1677_v27, %v1676_v56  ;;  %v1692_v50 = vsel %vm1673_vm8, %v1686_v18, 0.0 }
 0x1c3   :  { %v1689_v23 = vadd.f32 %v1688_v61, %v1687_v29 }
 0x1c4   :  { %v1680_v2 = vadd.f32 %v1679_v31, %v1678_v45 }
 0x1c5   :  { %v1691_v0 = vadd.f32 %v1690_v7, %v1689_v23 }
 0x1c6   :  { %1681 = vadd.xlane.f32.xlu1 %v1680_v2 }
 0x1c7   :  { %v1693_v11 = vadd.f32 %v1692_v50, %v1691_v0 }
 0x1c9   :  { %1694 = vadd.xlane.f32.xlu0 %v1693_v11 }
 0x24f   :  { %v1682_v62 = vpop.xlane.xlu1 %1681 }
 0x252   :  { %v1695_v20 = vpop.xlane.xlu0 %1694 }
 0x253   :  { %v1696_v57 = vsel %vm580_vm5, %v1682_v62, %v1695_v20 }
 0x254   :  { %1698 = vst.msk [vmem:[%s3021_s7] sm:$0xf] %vm1697_vm9, %v1696_v57 }

</bundles_post_ra>
